<compile_context>
chip_gen: v6e
topology: v6e:2x2x1
jax: 0.10.0
libtpu: 0.0.40
codegen_flags: <defaults>
</compile_context>

<pallas_src>
import functools

import jax
import jax.numpy as jnp
from jax.experimental import pallas as pl
from jax.experimental.pallas import tpu as pltpu


def mmoe_kernel(expert_num, expert_size, gate_num, tower_size,
                x_ref, w1_ref, b1_ref, tw_ref, twb_ref, ow_ref, ob_ref, out_ref):
    E, S, G, T = expert_num, expert_size, gate_num, tower_size
    x = x_ref[...]                                               # [TB, F]

    # ---- one wide MXU pass: all experts + all gate logits -----------------------
    h = jnp.dot(x, w1_ref[...], preferred_element_type=jnp.float32) + b1_ref[...]
    experts = jnp.maximum(h[:, :E * S], 0.0)                     # [TB, E*S]
    gate_lin = h[:, E * S:]                                      # [TB, G*E]

    # ---- per-gate softmax + unrolled 2D expert mixing (no [TB,E,S] relayout) ----
    mixed_parts = []
    for g in range(G):
        gl = gate_lin[:, g * E:(g + 1) * E]                      # [TB, E]
        m = jnp.max(gl, axis=-1, keepdims=True)
        e = jnp.exp(gl - m)
        gate = e * pl.reciprocal(jnp.sum(e, axis=-1, keepdims=True), approx=True)

        # weighted sum over experts as E multiply-adds on lane slices of the
        # already-materialized [TB, E*S] slab (stays on the VPU, no reshape).
        mixed = experts[:, 0:S] * gate[:, 0:1]
        for ei in range(1, E):
            mixed = mixed + experts[:, ei * S:(ei + 1) * S] * gate[:, ei:ei + 1]
        mixed_parts.append(mixed)                                # [TB, S]
    mixed_all = jnp.concatenate(mixed_parts, axis=-1)            # [TB, G*S]

    # ---- towers + output heads for all gates fused via block-diag weights -------
    tower = jnp.maximum(
        jnp.dot(mixed_all, tw_ref[...], preferred_element_type=jnp.float32)
        + twb_ref[...], 0.0)                                     # [TB, G*T]
    o_all = (jnp.dot(tower, ow_ref[...], preferred_element_type=jnp.float32)
             + ob_ref[...])                                      # [TB, G*2]

    # ---- per-gate 2-way softmax + clip, single lane-concat store -----------------
    outs = []
    for g in range(G):
        o = o_all[:, 2 * g:2 * (g + 1)]                          # [TB, 2]
        mo = jnp.max(o, axis=-1, keepdims=True)
        eo = jnp.exp(o - mo)
        o = eo * pl.reciprocal(jnp.sum(eo, axis=-1, keepdims=True), approx=True)
        outs.append(jnp.clip(o, 1e-15, 1.0 - 1e-15))
    # Output slab is only G*2 lanes wide (masked store); output bytes are tiny so
    # this is fine at these sizes.
    out_ref[...] = jnp.concatenate(outs, axis=-1)                # [TB, G*2]


def _block_diag(mats):
    """Block-diagonal concat of a list of 2D matrices (built once at init)."""
    n = len(mats)
    rows = []
    for i, m in enumerate(mats):
        row = [m if j == i else jnp.zeros((m.shape[0], mats[j].shape[1]), m.dtype)
               for j in range(n)]
        rows.append(jnp.concatenate(row, axis=1))
    return jnp.concatenate(rows, axis=0)


def prepare_mmoe_params(params, expert_num, expert_size, tower_size, gate_num):
    """One-time weight prep: fuse expert+gate matmuls and block-diag the towers.

    Hoisted out of the forward path so the pallas_call is the only per-step work.
    """
    ew, eb, gw, gb, tw, twb, ow, ob = params
    E, S, G, T = expert_num, expert_size, gate_num, tower_size
    F = ew.shape[1]

    # experts occupy cols [0, E*S), gates occupy cols [E*S, E*S + G*E)
    w1 = jnp.concatenate(
        [jnp.transpose(ew, (1, 0, 2)).reshape(F, E * S),
         jnp.transpose(gw, (1, 0, 2)).reshape(F, G * E)],
        axis=1)                                                  # [F, H]
    b1 = jnp.concatenate([eb.reshape(E * S), gb.reshape(G * E)]).reshape(1, -1)

    tw_big = _block_diag([tw[g] for g in range(G)])              # [G*S, G*T]
    twb_big = twb.reshape(1, G * T)
    ow_big = _block_diag([ow[g] for g in range(G)])              # [G*T, G*2]
    ob_big = ob.reshape(1, G * 2)
    return (w1, b1, tw_big, twb_big, ow_big, ob_big)


def mmoe_forward(x, fused_params, expert_num, expert_size, tower_size, gate_num,
                 batch_tile=None):
    w1, b1, tw_big, twb_big, ow_big, ob_big = fused_params
    B, F = x.shape
    E, S, G, T = expert_num, expert_size, gate_num, tower_size
    H = E * S + G * E

    # Batch tile: single grid step for small B; TB=2048 (multiple of 8) for large B.
    # (If B % TB != 0, the padded rows of the last tile are computed independently
    #  and dropped; no cross-row reductions exist in this kernel.)
    if batch_tile is None:
        TB = B if B <= 4096 else 2048
    else:
        TB = min(batch_tile, B)
    if TB != B and TB % 8 != 0:
        TB = max(8, (TB // 8) * 8)
    grid = (pl.cdiv(B, TB),)

    kernel = functools.partial(mmoe_kernel, E, S, G, T)
    out = pl.pallas_call(
        kernel,
        out_shape=jax.ShapeDtypeStruct((B, G * 2), jnp.float32),
        grid=grid,
        in_specs=[
            pl.BlockSpec((TB, F), lambda i: (i, 0)),           # x: batch-tiled, pipelined
            pl.BlockSpec((F, H), lambda i: (0, 0)),            # fused expert+gate weights
            pl.BlockSpec((1, H), lambda i: (0, 0)),            # fused biases
            pl.BlockSpec((G * S, G * T), lambda i: (0, 0)),    # block-diag tower weights
            pl.BlockSpec((1, G * T), lambda i: (0, 0)),        # tower biases
            pl.BlockSpec((G * T, G * 2), lambda i: (0, 0)),    # block-diag out weights
            pl.BlockSpec((1, G * 2), lambda i: (0, 0)),        # out biases
        ],
        out_specs=pl.BlockSpec((TB, G * 2), lambda i: (i, 0)),
        compiler_params=pltpu.CompilerParams(
            dimension_semantics=("arbitrary",),
            vmem_limit_bytes=64 * 1024 * 1024,   # never the constraint at these sizes
        ),
    )(x, w1, b1, tw_big, twb_big, ow_big, ob_big)

    # split slab back into the per-task [B, 2] list (matches PyTorch output)
    return [out[:, 2 * g:2 * (g + 1)] for g in range(G)]


def mmoe_reference(x, params, expert_num, gate_num):
    """Plain-JAX reference mirroring the PyTorch forward exactly."""
    ew, eb, gw, gb, tw, twb, ow, ob = params
    experts = [jax.nn.relu(x @ ew[e] + eb[e]) for e in range(expert_num)]
    expert_concat = jnp.stack(experts, axis=1)                  # [B, E, S]
    outs = []
    for g in range(gate_num):
        gate = jax.nn.softmax(x @ gw[g] + gb[g], axis=1)        # [B, E]
        mixed = jnp.sum(expert_concat * gate[:, :, None], axis=1)
        tower = jax.nn.relu(mixed @ tw[g] + twb[g])
        o = jax.nn.softmax(tower @ ow[g] + ob[g], axis=1)
        outs.append(jnp.clip(o, 1e-15, 1.0 - 1e-15))
    return outs


def init_params_constant(feature_size, expert_num, expert_size, tower_size, gate_num):
    # PyTorch module initializes every weight and bias to the constant 0.1.
    c = 0.1
    ew = jnp.full((expert_num, feature_size, expert_size), c, jnp.float32)
    eb = jnp.full((expert_num, expert_size), c, jnp.float32)
    gw = jnp.full((gate_num, feature_size, expert_num), c, jnp.float32)
    gb = jnp.full((gate_num, expert_num), c, jnp.float32)
    tw = jnp.full((gate_num, expert_size, tower_size), c, jnp.float32)
    twb = jnp.full((gate_num, tower_size), c, jnp.float32)
    ow = jnp.full((gate_num, tower_size, 2), c, jnp.float32)
    ob = jnp.full((gate_num, 2), c, jnp.float32)
    return (ew, eb, gw, gb, tw, twb, ow, ob)


def init_params_random(key, feature_size, expert_num, expert_size, tower_size, gate_num):
    ks = jax.random.split(key, 8)
    mk = lambda k, shape: 0.1 * jax.random.normal(k, shape, dtype=jnp.float32)
    return (mk(ks[0], (expert_num, feature_size, expert_size)),
            mk(ks[1], (expert_num, expert_size)),
            mk(ks[2], (gate_num, feature_size, expert_num)),
            mk(ks[3], (gate_num, expert_num)),
            mk(ks[4], (gate_num, expert_size, tower_size)),
            mk(ks[5], (gate_num, tower_size)),
            mk(ks[6], (gate_num, tower_size, 2)),
            mk(ks[7], (gate_num, 2)))


if __name__ == "__main__":
    batch = 64
    feature_size = 32
    expert_num = 4
    expert_size = 16
    tower_size = 8
    gate_num = 2

    key = jax.random.PRNGKey(0)
    kx, kp = jax.random.split(key)
    x = jax.random.normal(kx, (batch, feature_size), dtype=jnp.float32)

    # Tolerance is relaxed slightly because the kernel uses the EUP approximate
    # reciprocal for the softmax denominators.
    TOL = 5e-3

    # 1) random params, single-step grid (TB = B)
    params = init_params_random(kp, feature_size, expert_num, expert_size,
                                tower_size, gate_num)
    fused = prepare_mmoe_params(params, expert_num, expert_size, tower_size, gate_num)
    outs = mmoe_forward(x, fused, expert_num, expert_size, tower_size, gate_num)
    outs = [jax.block_until_ready(o) for o in outs]
    refs = mmoe_reference(x, params, expert_num, gate_num)
    for o, r in zip(outs, refs):
        assert o.shape == (batch, 2)
        assert jnp.allclose(o, r, atol=TOL, rtol=TOL), (o, r)

    # 2) constant-0.1 params (parity with PyTorch init), multi-step pipelined grid
    params_c = init_params_constant(feature_size, expert_num, expert_size,
                                    tower_size, gate_num)
    fused_c = prepare_mmoe_params(params_c, expert_num, expert_size, tower_size, gate_num)
    outs_c = mmoe_forward(x, fused_c, expert_num, expert_size, tower_size, gate_num,
                          batch_tile=32)
    outs_c = [jax.block_until_ready(o) for o in outs_c]
    refs_c = mmoe_reference(x, params_c, expert_num, gate_num)
    for o, r in zip(outs_c, refs_c):
        assert o.shape == (batch, 2)
        assert jnp.allclose(o, r, atol=TOL, rtol=TOL), (o, r)

    print("KERNEL_OK")
</pallas_src>

<mosaic_0001>
module attributes {stable_mosaic.version = 11 : i64} {
  func.func @mmoe_kernel(%arg0: i32, %arg1: memref<64x32xf32, #tpu.memory_space<vmem>>, %arg2: memref<32x72xf32, #tpu.memory_space<vmem>>, %arg3: memref<1x72xf32, #tpu.memory_space<vmem>>, %arg4: memref<32x16xf32, #tpu.memory_space<vmem>>, %arg5: memref<1x16xf32, #tpu.memory_space<vmem>>, %arg6: memref<16x4xf32, #tpu.memory_space<vmem>>, %arg7: memref<1x4xf32, #tpu.memory_space<vmem>>, %arg8: memref<64x4xf32, #tpu.memory_space<vmem>>) attributes {dimension_semantics = [#tpu.dimension_semantics<arbitrary>], iteration_bounds = array<i64: 1>, scalar_prefetch = 0 : i64, scratch_operands = 0 : i64, tpu.core_type = #tpu.core_type<tc>, window_params = [{transform_indices = @transform_0, window_bounds = array<i64: 64, 32>}, {pipeline_mode = #tpu.pipeline_mode<synchronous>, transform_indices = @transform_1, window_bounds = array<i64: 32, 72>}, {pipeline_mode = #tpu.pipeline_mode<synchronous>, transform_indices = @transform_2, window_bounds = array<i64: 1, 72>}, {pipeline_mode = #tpu.pipeline_mode<synchronous>, transform_indices = @transform_3, window_bounds = array<i64: 32, 16>}, {pipeline_mode = #tpu.pipeline_mode<synchronous>, transform_indices = @transform_4, window_bounds = array<i64: 1, 16>}, {pipeline_mode = #tpu.pipeline_mode<synchronous>, transform_indices = @transform_5, window_bounds = array<i64: 16, 4>}, {pipeline_mode = #tpu.pipeline_mode<synchronous>, transform_indices = @transform_6, window_bounds = array<i64: 1, 4>}, {transform_indices = @transform_7, window_bounds = array<i64: 64, 4>}]} {
    %c0 = arith.constant 0 : index
    %c0_0 = arith.constant 0 : index
    %0 = vector.load %arg1[%c0, %c0_0] : memref<64x32xf32, #tpu.memory_space<vmem>>, vector<64x32xf32>
    %c0_1 = arith.constant 0 : index
    %c0_2 = arith.constant 0 : index
    %1 = vector.load %arg2[%c0_1, %c0_2] : memref<32x72xf32, #tpu.memory_space<vmem>>, vector<32x72xf32>
    %cst = arith.constant dense<0.000000e+00> : vector<64x72xf32>
    %2 = tpu.matmul %0, %1, %cst {dimension_numbers = #tpu.dot_dimension_numbers<[1], [0], [0], [1], [0, 0, 1, 1], [], []>} : vector<64x32xf32>, vector<32x72xf32>, vector<64x72xf32> -> vector<64x72xf32>
    %c0_3 = arith.constant 0 : index
    %c0_4 = arith.constant 0 : index
    %3 = vector.load %arg3[%c0_3, %c0_4] : memref<1x72xf32, #tpu.memory_space<vmem>>, vector<1x72xf32>
    %4 = vector.broadcast %3 : vector<1x72xf32> to vector<64x72xf32>
    %5 = arith.addf %2, %4 : vector<64x72xf32>
    %6 = vector.extract_strided_slice %5 {offsets = [0, 0], sizes = [64, 64], strides = [1, 1]} : vector<64x72xf32> to vector<64x64xf32>
    %cst_5 = arith.constant 0.000000e+00 : f32
    %7 = vector.broadcast %cst_5 : f32 to vector<64x64xf32>
    %8 = arith.maximumf %6, %7 : vector<64x64xf32>
    %9 = vector.extract_strided_slice %5 {offsets = [0, 64], sizes = [64, 8], strides = [1, 1]} : vector<64x72xf32> to vector<64x8xf32>
    %10 = vector.extract_strided_slice %9 {offsets = [0, 0], sizes = [64, 4], strides = [1, 1]} : vector<64x8xf32> to vector<64x4xf32>
    %cst_6 = arith.constant dense<0xFF800000> : vector<64xf32>
    %11 = vector.multi_reduction <maximumf>, %10, %cst_6 [1] : vector<64x4xf32> to vector<64xf32>
    %12 = vector.shape_cast %11 : vector<64xf32> to vector<64x1xf32>
    %13 = vector.broadcast %12 : vector<64x1xf32> to vector<64x4xf32>
    %14 = arith.subf %10, %13 : vector<64x4xf32>
    %15 = math.exp %14 : vector<64x4xf32>
    %cst_7 = arith.constant dense<0.000000e+00> : vector<64xf32>
    %16 = vector.multi_reduction <add>, %15, %cst_7 [1] : vector<64x4xf32> to vector<64xf32>
    %17 = vector.shape_cast %16 : vector<64xf32> to vector<64x1xf32>
    %18 = tpu.reciprocal %17 {approx = true} : vector<64x1xf32> -> vector<64x1xf32>
    %19 = vector.broadcast %18 : vector<64x1xf32> to vector<64x4xf32>
    %20 = arith.mulf %15, %19 : vector<64x4xf32>
    %21 = vector.extract_strided_slice %8 {offsets = [0, 0], sizes = [64, 16], strides = [1, 1]} : vector<64x64xf32> to vector<64x16xf32>
    %22 = vector.extract_strided_slice %20 {offsets = [0, 0], sizes = [64, 1], strides = [1, 1]} : vector<64x4xf32> to vector<64x1xf32>
    %23 = vector.broadcast %22 : vector<64x1xf32> to vector<64x16xf32>
    %24 = arith.mulf %21, %23 : vector<64x16xf32>
    %25 = vector.extract_strided_slice %8 {offsets = [0, 16], sizes = [64, 16], strides = [1, 1]} : vector<64x64xf32> to vector<64x16xf32>
    %26 = vector.extract_strided_slice %20 {offsets = [0, 1], sizes = [64, 1], strides = [1, 1]} : vector<64x4xf32> to vector<64x1xf32>
    %27 = vector.broadcast %26 : vector<64x1xf32> to vector<64x16xf32>
    %28 = arith.mulf %25, %27 : vector<64x16xf32>
    %29 = arith.addf %24, %28 : vector<64x16xf32>
    %30 = vector.extract_strided_slice %8 {offsets = [0, 32], sizes = [64, 16], strides = [1, 1]} : vector<64x64xf32> to vector<64x16xf32>
    %31 = vector.extract_strided_slice %20 {offsets = [0, 2], sizes = [64, 1], strides = [1, 1]} : vector<64x4xf32> to vector<64x1xf32>
    %32 = vector.broadcast %31 : vector<64x1xf32> to vector<64x16xf32>
    %33 = arith.mulf %30, %32 : vector<64x16xf32>
    %34 = arith.addf %29, %33 : vector<64x16xf32>
    %35 = vector.extract_strided_slice %8 {offsets = [0, 48], sizes = [64, 16], strides = [1, 1]} : vector<64x64xf32> to vector<64x16xf32>
    %36 = vector.extract_strided_slice %20 {offsets = [0, 3], sizes = [64, 1], strides = [1, 1]} : vector<64x4xf32> to vector<64x1xf32>
    %37 = vector.broadcast %36 : vector<64x1xf32> to vector<64x16xf32>
    %38 = arith.mulf %35, %37 : vector<64x16xf32>
    %39 = arith.addf %34, %38 : vector<64x16xf32>
    %40 = vector.extract_strided_slice %9 {offsets = [0, 4], sizes = [64, 4], strides = [1, 1]} : vector<64x8xf32> to vector<64x4xf32>
    %cst_8 = arith.constant dense<0xFF800000> : vector<64xf32>
    %41 = vector.multi_reduction <maximumf>, %40, %cst_8 [1] : vector<64x4xf32> to vector<64xf32>
    %42 = vector.shape_cast %41 : vector<64xf32> to vector<64x1xf32>
    %43 = vector.broadcast %42 : vector<64x1xf32> to vector<64x4xf32>
    %44 = arith.subf %40, %43 : vector<64x4xf32>
    %45 = math.exp %44 : vector<64x4xf32>
    %cst_9 = arith.constant dense<0.000000e+00> : vector<64xf32>
    %46 = vector.multi_reduction <add>, %45, %cst_9 [1] : vector<64x4xf32> to vector<64xf32>
    %47 = vector.shape_cast %46 : vector<64xf32> to vector<64x1xf32>
    %48 = tpu.reciprocal %47 {approx = true} : vector<64x1xf32> -> vector<64x1xf32>
    %49 = vector.broadcast %48 : vector<64x1xf32> to vector<64x4xf32>
    %50 = arith.mulf %45, %49 : vector<64x4xf32>
    %51 = vector.extract_strided_slice %8 {offsets = [0, 0], sizes = [64, 16], strides = [1, 1]} : vector<64x64xf32> to vector<64x16xf32>
    %52 = vector.extract_strided_slice %50 {offsets = [0, 0], sizes = [64, 1], strides = [1, 1]} : vector<64x4xf32> to vector<64x1xf32>
    %53 = vector.broadcast %52 : vector<64x1xf32> to vector<64x16xf32>
    %54 = arith.mulf %51, %53 : vector<64x16xf32>
    %55 = vector.extract_strided_slice %8 {offsets = [0, 16], sizes = [64, 16], strides = [1, 1]} : vector<64x64xf32> to vector<64x16xf32>
    %56 = vector.extract_strided_slice %50 {offsets = [0, 1], sizes = [64, 1], strides = [1, 1]} : vector<64x4xf32> to vector<64x1xf32>
    %57 = vector.broadcast %56 : vector<64x1xf32> to vector<64x16xf32>
    %58 = arith.mulf %55, %57 : vector<64x16xf32>
    %59 = arith.addf %54, %58 : vector<64x16xf32>
    %60 = vector.extract_strided_slice %8 {offsets = [0, 32], sizes = [64, 16], strides = [1, 1]} : vector<64x64xf32> to vector<64x16xf32>
    %61 = vector.extract_strided_slice %50 {offsets = [0, 2], sizes = [64, 1], strides = [1, 1]} : vector<64x4xf32> to vector<64x1xf32>
    %62 = vector.broadcast %61 : vector<64x1xf32> to vector<64x16xf32>
    %63 = arith.mulf %60, %62 : vector<64x16xf32>
    %64 = arith.addf %59, %63 : vector<64x16xf32>
    %65 = vector.extract_strided_slice %8 {offsets = [0, 48], sizes = [64, 16], strides = [1, 1]} : vector<64x64xf32> to vector<64x16xf32>
    %66 = vector.extract_strided_slice %50 {offsets = [0, 3], sizes = [64, 1], strides = [1, 1]} : vector<64x4xf32> to vector<64x1xf32>
    %67 = vector.broadcast %66 : vector<64x1xf32> to vector<64x16xf32>
    %68 = arith.mulf %65, %67 : vector<64x16xf32>
    %69 = arith.addf %64, %68 : vector<64x16xf32>
    %70 = tpu.concatenate %39, %69 in 1 : vector<64x16xf32>, vector<64x16xf32> -> vector<64x32xf32>
    %c0_10 = arith.constant 0 : index
    %c0_11 = arith.constant 0 : index
    %71 = vector.load %arg4[%c0_10, %c0_11] : memref<32x16xf32, #tpu.memory_space<vmem>>, vector<32x16xf32>
    %cst_12 = arith.constant dense<0.000000e+00> : vector<64x16xf32>
    %72 = tpu.matmul %70, %71, %cst_12 {dimension_numbers = #tpu.dot_dimension_numbers<[1], [0], [0], [1], [0, 0, 1, 1], [], []>} : vector<64x32xf32>, vector<32x16xf32>, vector<64x16xf32> -> vector<64x16xf32>
    %c0_13 = arith.constant 0 : index
    %c0_14 = arith.constant 0 : index
    %73 = vector.load %arg5[%c0_13, %c0_14] : memref<1x16xf32, #tpu.memory_space<vmem>>, vector<1x16xf32>
    %74 = vector.broadcast %73 : vector<1x16xf32> to vector<64x16xf32>
    %75 = arith.addf %72, %74 : vector<64x16xf32>
    %cst_15 = arith.constant 0.000000e+00 : f32
    %76 = vector.broadcast %cst_15 : f32 to vector<64x16xf32>
    %77 = arith.maximumf %75, %76 : vector<64x16xf32>
    %c0_16 = arith.constant 0 : index
    %c0_17 = arith.constant 0 : index
    %78 = vector.load %arg6[%c0_16, %c0_17] : memref<16x4xf32, #tpu.memory_space<vmem>>, vector<16x4xf32>
    %cst_18 = arith.constant dense<0.000000e+00> : vector<64x4xf32>
    %79 = tpu.matmul %77, %78, %cst_18 {dimension_numbers = #tpu.dot_dimension_numbers<[1], [0], [0], [1], [0, 0, 1, 1], [], []>} : vector<64x16xf32>, vector<16x4xf32>, vector<64x4xf32> -> vector<64x4xf32>
    %c0_19 = arith.constant 0 : index
    %c0_20 = arith.constant 0 : index
    %80 = vector.load %arg7[%c0_19, %c0_20] : memref<1x4xf32, #tpu.memory_space<vmem>>, vector<1x4xf32>
    %81 = vector.broadcast %80 : vector<1x4xf32> to vector<64x4xf32>
    %82 = arith.addf %79, %81 : vector<64x4xf32>
    %83 = vector.extract_strided_slice %82 {offsets = [0, 0], sizes = [64, 2], strides = [1, 1]} : vector<64x4xf32> to vector<64x2xf32>
    %cst_21 = arith.constant dense<0xFF800000> : vector<64xf32>
    %84 = vector.multi_reduction <maximumf>, %83, %cst_21 [1] : vector<64x2xf32> to vector<64xf32>
    %85 = vector.shape_cast %84 : vector<64xf32> to vector<64x1xf32>
    %86 = vector.broadcast %85 : vector<64x1xf32> to vector<64x2xf32>
    %87 = arith.subf %83, %86 : vector<64x2xf32>
    %88 = math.exp %87 : vector<64x2xf32>
    %cst_22 = arith.constant dense<0.000000e+00> : vector<64xf32>
    %89 = vector.multi_reduction <add>, %88, %cst_22 [1] : vector<64x2xf32> to vector<64xf32>
    %90 = vector.shape_cast %89 : vector<64xf32> to vector<64x1xf32>
    %91 = tpu.reciprocal %90 {approx = true} : vector<64x1xf32> -> vector<64x1xf32>
    %92 = vector.broadcast %91 : vector<64x1xf32> to vector<64x2xf32>
    %93 = arith.mulf %88, %92 : vector<64x2xf32>
    %cst_23 = arith.constant 1.000000e-15 : f32
    %cst_24 = arith.constant 1.000000e+00 : f32
    %94 = vector.broadcast %cst_23 : f32 to vector<64x2xf32>
    %95 = arith.maximumf %94, %93 : vector<64x2xf32>
    %96 = vector.broadcast %cst_24 : f32 to vector<64x2xf32>
    %97 = arith.minimumf %96, %95 : vector<64x2xf32>
    %98 = vector.extract_strided_slice %82 {offsets = [0, 2], sizes = [64, 2], strides = [1, 1]} : vector<64x4xf32> to vector<64x2xf32>
    %cst_25 = arith.constant dense<0xFF800000> : vector<64xf32>
    %99 = vector.multi_reduction <maximumf>, %98, %cst_25 [1] : vector<64x2xf32> to vector<64xf32>
    %100 = vector.shape_cast %99 : vector<64xf32> to vector<64x1xf32>
    %101 = vector.broadcast %100 : vector<64x1xf32> to vector<64x2xf32>
    %102 = arith.subf %98, %101 : vector<64x2xf32>
    %103 = math.exp %102 : vector<64x2xf32>
    %cst_26 = arith.constant dense<0.000000e+00> : vector<64xf32>
    %104 = vector.multi_reduction <add>, %103, %cst_26 [1] : vector<64x2xf32> to vector<64xf32>
    %105 = vector.shape_cast %104 : vector<64xf32> to vector<64x1xf32>
    %106 = tpu.reciprocal %105 {approx = true} : vector<64x1xf32> -> vector<64x1xf32>
    %107 = vector.broadcast %106 : vector<64x1xf32> to vector<64x2xf32>
    %108 = arith.mulf %103, %107 : vector<64x2xf32>
    %cst_27 = arith.constant 1.000000e-15 : f32
    %cst_28 = arith.constant 1.000000e+00 : f32
    %109 = vector.broadcast %cst_27 : f32 to vector<64x2xf32>
    %110 = arith.maximumf %109, %108 : vector<64x2xf32>
    %111 = vector.broadcast %cst_28 : f32 to vector<64x2xf32>
    %112 = arith.minimumf %111, %110 : vector<64x2xf32>
    %113 = tpu.concatenate %97, %112 in 1 : vector<64x2xf32>, vector<64x2xf32> -> vector<64x4xf32>
    %c0_29 = arith.constant 0 : index
    %c0_30 = arith.constant 0 : index
    %114 = vector.load %arg8[%c0_29, %c0_30] : memref<64x4xf32, #tpu.memory_space<vmem>>, vector<64x4xf32>
    tpu.vector_store %arg8[%c0_29, %c0_30], %113 {strides = array<i32>} : memref<64x4xf32, #tpu.memory_space<vmem>>, vector<64x4xf32>,
    return
  }
  func.func @transform_0(%arg0: i32) -> (i32, i32) {
    %c0_i32 = arith.constant 0 : i32
    %c0_i32_0 = arith.constant 0 : i32
    return %arg0, %c0_i32 : i32, i32
  }
  func.func @transform_1(%arg0: i32) -> (i32, i32) {
    %c0_i32 = arith.constant 0 : i32
    %c0_i32_0 = arith.constant 0 : i32
    %c0_i32_1 = arith.constant 0 : i32
    return %c0_i32, %c0_i32_0 : i32, i32
  }
  func.func @transform_2(%arg0: i32) -> (i32, i32) {
    %c0_i32 = arith.constant 0 : i32
    %c0_i32_0 = arith.constant 0 : i32
    %c0_i32_1 = arith.constant 0 : i32
    return %c0_i32, %c0_i32_0 : i32, i32
  }
  func.func @transform_3(%arg0: i32) -> (i32, i32) {
    %c0_i32 = arith.constant 0 : i32
    %c0_i32_0 = arith.constant 0 : i32
    %c0_i32_1 = arith.constant 0 : i32
    return %c0_i32, %c0_i32_0 : i32, i32
  }
  func.func @transform_4(%arg0: i32) -> (i32, i32) {
    %c0_i32 = arith.constant 0 : i32
    %c0_i32_0 = arith.constant 0 : i32
    %c0_i32_1 = arith.constant 0 : i32
    return %c0_i32, %c0_i32_0 : i32, i32
  }
  func.func @transform_5(%arg0: i32) -> (i32, i32) {
    %c0_i32 = arith.constant 0 : i32
    %c0_i32_0 = arith.constant 0 : i32
    %c0_i32_1 = arith.constant 0 : i32
    return %c0_i32, %c0_i32_0 : i32, i32
  }
  func.func @transform_6(%arg0: i32) -> (i32, i32) {
    %c0_i32 = arith.constant 0 : i32
    %c0_i32_0 = arith.constant 0 : i32
    %c0_i32_1 = arith.constant 0 : i32
    return %c0_i32, %c0_i32_0 : i32, i32
  }
  func.func @transform_7(%arg0: i32) -> (i32, i32) {
    %c0_i32 = arith.constant 0 : i32
    %c0_i32_0 = arith.constant 0 : i32
    return %arg0, %c0_i32 : i32, i32
  }
}

</mosaic_0001>

<bundles_post_ra>
// kernel: tpu_custom_call.1
= control target key start
LH: loop header
LB: loop body
LE: loop exit
PB: predicated region body
PF: predicated region fallthrough
CT: control target
= control target key end

     0   :  { %vm45_vm0 = vcmask 261120   ;;  %vm593_vm1 = vcmask 589344   ;;  %vm183_vm2 = vcmask 556544   ;;  %vm264_vm3 = vcmask 31744   ;;  %s1928_s26 = smov 96   ;;  %s1929_s27 = smov 80   ;;  %s2794_s1 = inlined_call_operand.vmem [shape: f32[32,72], index: 1, kind: input, shape index: {}]   ;;  %s2795_s0 = inlined_call_operand.vmem [shape: f32[64,32], index: 0, kind: input, shape index: {}]   ;;  %s2796_s2 = inlined_call_operand.vmem [shape: f32[1,72], index: 2, kind: input, shape index: {}]   ;;  %s2797_s3 = inlined_call_operand.vmem [shape: f32[32,16], index: 3, kind: input, shape index: {}]   ;;  %s2798_s5 = inlined_call_operand.vmem [shape: f32[16,4], index: 5, kind: input, shape index: {}]   ;;  %s2799_s4 = inlined_call_operand.vmem [shape: f32[1,16], index: 4, kind: input, shape index: {}]   ;;  %s2800_s6 = inlined_call_operand.vmem [shape: f32[1,4], index: 6, kind: input, shape index: {}]   ;;  %s2801_s7 = inlined_call_operand.vmem [shape: f32[64,4], index: 7, kind: output, shape index: {}]  }
   0x1   :  { %v37_v0 = vld [vmem:[%s2794_s1 + $0x18] sm:$0xff]  ;;  %v36_v1 = vld [vmem:[%s2794_s1 + $0x10] sm:$0xff]  ;;  %v35_v2 = vld [vmem:[%s2794_s1 + $0x8] sm:$0xff]  ;;  %s1930_s28 = smov 112   ;;  %s1931_s12 = smov 16   ;;  %vm1034_vm4 = vcmask 130048  }
   0x2   :  { %1652 = vmatprep.subr.mxu0 %v37_v0  ;;  %1708 = vmatprep.subr.mxu1 %v37_v0  ;;  %v34_v3 = vld [vmem:[%s2794_s1] sm:$0xff]  ;;  %v27_v6 = vld [vmem:[%s2795_s0 + $0x8] sm:$0xff]  ;;  %v28_v8 = vld [vmem:[%s2795_s0 + $0x10] sm:$0xff]  ;;  %vm1434_vm5 = vcmask 31760   ;;  %vm1329_vm6 = vcmask 15360  }
   0x3   :  { %1653 = vmatpush3.msra.mxu0 %v37_v0  ;;  %1712 = vmatpush3.msra.mxu1 %v37_v0  ;;  %v26_v4 = vld [vmem:[%s2795_s0] sm:$0xff]  ;;  %v31_v7 = vld [vmem:[%s2795_s0 + $0x28] sm:$0xff]  ;;  %v32_v9 = vld [vmem:[%s2795_s0 + $0x30] sm:$0xff] }
   0x4   :  { %1654 = vmatprep.subr.mxu0 %v36_v1  ;;  %1709 = vmatprep.subr.mxu1 %v36_v1  ;;  %v30_v5 = vld [vmem:[%s2795_s0 + $0x20] sm:$0xff]  ;;  %v29_v10 = vld [vmem:[%s2795_s0 + $0x18] sm:$0xff] }
   0x5   :  { %1655 = vmatpush3.msra.mxu0 %v36_v1  ;;  %1713 = vmatpush3.msra.mxu1 %v36_v1  ;;  %v33_v11 = vld [vmem:[%s2795_s0 + $0x38] sm:$0xff]  ;;  %v1591_v12 = vld [vmem:[%s2796_s2] ss:$0 sm:$0xff]  ;;  %s1918_s0 = smov 60   ;;  %s1919_s2 = smov 64  }
   0x6   :  { %1656 = vmatprep.subr.mxu0 %v35_v2  ;;  %1710 = vmatprep.subr.mxu1 %v35_v2 }
   0x7   :  { %1657 = vmatpush3.msra.mxu0 %v35_v2  ;;  %1714 = vmatpush3.msra.mxu1 %v35_v2 }
   0x8   :  { %1658 = vmatprep.subr.mxu0 %v34_v3  ;;  %1711 = vmatprep.subr.mxu1 %v34_v3 }
   0x9   :  { %1659 = vmatpush3.msra.mxu0 %v34_v3  ;;  %1715 = vmatpush3.msra.mxu1 %v34_v3 }
   0xa   :  { %1660 = vmatprep.mubr.msk.f32.mxu0 %vm45_vm0, %v26_v4  ;;  %1666 = vmatprep.mubr.msk.f32.mxu1 %vm45_vm0, %v30_v5 }
   0xb   :  { %1661 = vmatmul.mubr.msk.f32.vlgmr.msra.gmra.mxu0 %vm45_vm0, %v27_v6  ;;  %1667 = vmatmul.mubr.msk.f32.vlgmr.msra.gmra.mxu1 %vm45_vm0, %v31_v7 }
   0xc   :  { %1663 = vmatprep.mubr.msk.f32.mxu0 %vm45_vm0, %v28_v8  ;;  %1669 = vmatprep.mubr.msk.f32.mxu1 %vm45_vm0, %v32_v9 }
   0xf   :  { %1664 = vmatmul.mubr.msk.f32.gmra.mxu0 %vm45_vm0, %v29_v10  ;;  %1670 = vmatmul.mubr.msk.f32.gmra.mxu1 %vm45_vm0, %v33_v11 }
  0xcb   :  { %v1662_v13 = vpop.f32.mrf.mxu0  ;;  %v1668_v14 = vpop.f32.mrf.mxu1 }
  0xcc   :  { %v2020_v15 = vadd.f32 %v1662_v13, %v1591_v12  ;;  %v2022_v16 = vadd.f32 %v1668_v14, %v1591_v12 }
  0xcd   :  { %v136_v17 = vpop.f32.mrf.mxu0  ;;  %v156_v19 = vpop.f32.mrf.mxu1 }
  0xce   :  { %v609_v18 = vsel %vm593_vm1, %v2022_v16, -inf  ;;  %v2026_v20 = vadd.f32 %v1591_v12, %v136_v17  ;;  %v597_v21 = vsel %vm593_vm1, %v2020_v15, -inf  ;;  %v2030_v22 = vadd.f32 %v1591_v12, %v156_v19 }
  0xcf   :  { %610 = vmax.xlane.f32.xlu1 %v609_v18  ;;  %598 = vmax.xlane.f32.xlu0 %v597_v21  ;;  %v1665_v23 = vpop.f32.mrf.mxu0  ;;  %v187_v24 = vsel %vm183_vm2, %v2020_v15, -inf  ;;  %v199_v26 = vsel %vm183_vm2, %v2022_v16, -inf  ;;  %v1671_v29 = vpop.f32.mrf.mxu1 }
  0xd0   :  { %v594_v25 = vsel %vm593_vm1, %v2026_v20, -inf  ;;  %v2038_v27 = vadd.f32 %v1665_v23, %v1591_v12  ;;  %v606_v28 = vsel %vm593_vm1, %v2030_v22, -inf  ;;  %v2042_v30 = vadd.f32 %v1671_v29, %v1591_v12 }
  0xd1   :  { %v166_v32 = vpop.f32.mrf.mxu1  ;;  %v184_v33 = vsel %vm183_vm2, %v2026_v20, -inf  ;;  %v146_v36 = vpop.f32.mrf.mxu0  ;;  %v196_v37 = vsel %vm183_vm2, %v2030_v22, -inf }
  0xd2   :  { %v603_v31 = vsel %vm593_vm1, %v2038_v27, -inf  ;;  %v615_v34 = vsel %vm593_vm1, %v2042_v30, -inf  ;;  %v2050_v35 = vadd.f32 %v1591_v12, %v166_v32  ;;  %v193_v38 = vsel %vm183_vm2, %v2038_v27, -inf }
  0xd3   :  { %188 = vmax.xlane.f32.xlu1 %v187_v24  ;;  %595 = vmax.xlane.f32.xlu0 %v594_v25  ;;  %v2056_v39 = vadd.f32 %v1591_v12, %v146_v36  ;;  %v205_v41 = vsel %vm183_vm2, %v2042_v30, -inf }
  0xd4   :  { %v612_v40 = vsel %vm593_vm1, %v2050_v35, -inf  ;;  %v202_v44 = vsel %vm183_vm2, %v2050_v35, -inf }
  0xd5   :  { %v190_v42 = vsel %vm183_vm2, %v2056_v39, -inf  ;;  %v600_v43 = vsel %vm593_vm1, %v2056_v39, -inf }
  0xd7   :  { %200 = vmax.xlane.f32.xlu1 %v199_v26  ;;  %607 = vmax.xlane.f32.xlu0 %v606_v28 }
  0xdb   :  { %604 = vmax.xlane.f32.xlu1 %v603_v31  ;;  %185 = vmax.xlane.f32.xlu0 %v184_v33 }
  0xdf   :  { %616 = vmax.xlane.f32.xlu1 %v615_v34  ;;  %197 = vmax.xlane.f32.xlu0 %v196_v37 }
  0xe3   :  { %194 = vmax.xlane.f32.xlu1 %v193_v38  ;;  %613 = vmax.xlane.f32.xlu0 %v612_v40 }
  0xe7   :  { %206 = vmax.xlane.f32.xlu1 %v205_v41  ;;  %191 = vmax.xlane.f32.xlu0 %v190_v42 }
  0xeb   :  { %601 = vmax.xlane.f32.xlu1 %v600_v43  ;;  %203 = vmax.xlane.f32.xlu0 %v202_v44 }
 0x158   :  { %v611_v45 = vpop.xlane.xlu1 %610  ;;  %v599_v47 = vpop.xlane.xlu0 %598 }
 0x159   :  { %v623_v46 = vsub.f32 %v2022_v16, %v611_v45  ;;  %v619_v48 = vsub.f32 %v2020_v15, %v599_v47 }
 0x15b   :  { %v628_v49 = vmul.f32 1.442695, %v619_v48  ;;  %v636_v51 = vmul.f32 1.442695, %v623_v46 }
 0x15c   :  { %v189_v50 = vpop.xlane.xlu1 %188  ;;  %v596_v53 = vpop.xlane.xlu0 %595 }
 0x15d   :  { %v209_v52 = vsub.f32 %v2020_v15, %v189_v50  ;;  %1790 = vpow2.f32 %v628_v49  ;;  %v618_v54 = vsub.f32 %v2026_v20, %v596_v53 }
 0x15e   :  { %1792 = vpow2.f32 %v636_v51 }
 0x15f   :  { %v626_v55 = vmul.f32 1.442695, %v618_v54  ;;  %v218_v57 = vmul.f32 1.442695, %v209_v52 }
 0x160   :  { %v201_v56 = vpop.xlane.xlu1 %200  ;;  %v608_v59 = vpop.xlane.xlu0 %607 }
 0x161   :  { %v213_v58 = vsub.f32 %v2022_v16, %v201_v56  ;;  %1794 = vpow2.f32 %v626_v55  ;;  %v622_v60 = vsub.f32 %v2030_v22, %v608_v59 }
 0x162   :  { %1796 = vpow2.f32 %v218_v57 }
 0x163   :  { %v634_v61 = vmul.f32 1.442695, %v622_v60  ;;  %v226_v63 = vmul.f32 1.442695, %v213_v58 }
 0x164   :  { %v605_v62 = vpop.xlane.xlu1 %604  ;;  %v186_v1 = vpop.xlane.xlu0 %185 }
 0x165   :  { %v621_v0 = vsub.f32 %v2038_v27, %v605_v62  ;;  %1798 = vpow2.f32 %v634_v61  ;;  %v208_v2 = vsub.f32 %v2026_v20, %v186_v1 }
 0x166   :  { %1800 = vpow2.f32 %v226_v63 }
 0x167   :  { %v216_v3 = vmul.f32 1.442695, %v208_v2  ;;  %v632_v5 = vmul.f32 1.442695, %v621_v0 }
 0x168   :  { %v617_v4 = vpop.xlane.xlu1 %616  ;;  %v198_v7 = vpop.xlane.xlu0 %197 }
 0x169   :  { %v625_v6 = vsub.f32 %v2042_v30, %v617_v4  ;;  %1802 = vpow2.f32 %v216_v3  ;;  %v212_v8 = vsub.f32 %v2030_v22, %v198_v7 }
 0x16a   :  { %v2078_v9 = vpop.eup %1790  ;;  %1804 = vpow2.f32 %v632_v5 }
 0x16b   :  { %v224_v10 = vmul.f32 1.442695, %v212_v8  ;;  %652 = vrot.lane.b32.xlu1 %v2078_v9, %s1918_s0  ;;  %v640_v12 = vmul.f32 1.442695, %v625_v6  ;;  %v2083_v17 = vpop.eup %1792 }
 0x16c   :  { %v195_v11 = vpop.xlane.xlu1 %194  ;;  %v614_v14 = vpop.xlane.xlu0 %613 }
 0x16d   :  { %v211_v13 = vsub.f32 %v2038_v27, %v195_v11  ;;  %1806 = vpow2.f32 %v224_v10  ;;  %v624_v18 = vsub.f32 %v2050_v35, %v614_v14 }
 0x16e   :  { %v2086_v19 = vpop.eup %1794  ;;  %1808 = vpow2.f32 %v640_v12  ;;  %v1920_v12 = vmov 69  }
 0x16f   :  { %v638_v21 = vmul.f32 1.442695, %v624_v18  ;;  %660 = vrot.lane.b32.xlu1 %v2083_v17, %s1918_s0  ;;  %650 = vrot.lane.b32.xlu0 %v2086_v19, %s1918_s0  ;;  %v222_v24 = vmul.f32 1.442695, %v211_v13  ;;  %v2093_v28 = vpop.eup %1796 }
 0x170   :  { %v207_v23 = vpop.xlane.xlu1 %206  ;;  %v192_v26 = vpop.xlane.xlu0 %191  ;;  %1731 = vset.pattern.permute.xlu1 %v1920_v12  ;;  %1734 = vset.pattern.permute.xlu0 %v1920_v12 }
 0x171   :  { %v215_v25 = vsub.f32 %v2042_v30, %v207_v23  ;;  %1810 = vpow2.f32 %v638_v21  ;;  %v210_v29 = vsub.f32 %v2056_v39, %v192_v26 }
 0x172   :  { %v2096_v31 = vpop.eup %1798  ;;  %1812 = vpow2.f32 %v222_v24 }
 0x173   :  { %v220_v32 = vmul.f32 1.442695, %v210_v29  ;;  %242 = vrot.lane.b32.xlu1 %v2093_v28, %s1919_s2  ;;  %658 = vrot.lane.b32.xlu0 %v2096_v31, %s1918_s0  ;;  %v230_v34 = vmul.f32 1.442695, %v215_v25  ;;  %v2102_v37 = vpop.eup %1800 }
 0x174   :  { %v602_v33 = vpop.xlane.xlu1 %601  ;;  %v204_v36 = vpop.xlane.xlu0 %203 }
 0x175   :  { %1814 = vpow2.f32 %v220_v32  ;;  %v620_v38 = vsub.f32 %v2056_v39, %v602_v33  ;;  %v214_v40 = vsub.f32 %v2050_v35, %v204_v36 }
 0x176   :  { %v2106_v41 = vpop.eup %1802  ;;  %1816 = vpow2.f32 %v230_v34 }
 0x177   :  { %v228_v42 = vmul.f32 1.442695, %v214_v40  ;;  %250 = vrot.lane.b32.xlu1 %v2102_v37, %s1919_s2  ;;  %240 = vrot.lane.b32.xlu0 %v2106_v41, %s1919_s2  ;;  %v2112_v43 = vpop.eup %1804  ;;  %v630_v44 = vmul.f32 1.442695, %v620_v38 }
 0x179   :  { %1818 = vpow2.f32 %v228_v42 }
 0x17a   :  { %v2114_v45 = vpop.eup %1806  ;;  %1820 = vpow2.f32 %v630_v44 }
 0x17b   :  { %656 = vrot.lane.b32.xlu1 %v2112_v43, %s1918_s0  ;;  %248 = vrot.lane.b32.xlu0 %v2114_v45, %s1919_s2  ;;  %v2120_v46 = vpop.eup %1808 }
 0x17e   :  { %v2122_v47 = vpop.eup %1810 }
 0x17f   :  { %664 = vrot.lane.b32.xlu1 %v2120_v46, %s1918_s0  ;;  %662 = vrot.lane.b32.xlu0 %v2122_v47, %s1918_s0  ;;  %v2128_v48 = vpop.eup %1812 }
 0x182   :  { %v2130_v49 = vpop.eup %1814 }
 0x183   :  { %246 = vrot.lane.b32.xlu1 %v2128_v48, %s1919_s2  ;;  %244 = vrot.lane.b32.xlu0 %v2130_v49, %s1919_s2  ;;  %v2136_v50 = vpop.eup %1816 }
 0x186   :  { %v2138_v51 = vpop.eup %1818 }
 0x187   :  { %254 = vrot.lane.b32.xlu1 %v2136_v50, %s1919_s2  ;;  %252 = vrot.lane.b32.xlu0 %v2138_v51, %s1919_s2  ;;  %v2144_v52 = vpop.eup %1820 }
 0x18b   :  { %654 = vrot.lane.b32.xlu1 %v2144_v52, %s1918_s0 }
 0x1dd   :  { %v653_v53 = vpop.permute.xlu1 %652 }
 0x1de   :  { %v677_v54 = vsel %vm264_vm3, %v653_v53, 0.0 }
 0x1df   :  { %678 = vadd.xlane.f32.xlu1 %v677_v54 }
 0x1e1   :  { %v661_v55 = vpop.permute.xlu1 %660  ;;  %v651_v56 = vpop.permute.xlu0 %650 }
 0x1e2   :  { %v689_v57 = vsel %vm264_vm3, %v661_v55, 0.0  ;;  %v674_v63 = vsel %vm264_vm3, %v651_v56, 0.0  ;;  %v1921_v55 = vmov 70  }
 0x1e3   :  { %690 = vadd.xlane.f32.xlu1 %v689_v57  ;;  %v1922_v57 = vmov 71  }
 0x1e5   :  { %v243_v58 = vpop.permute.xlu1 %242  ;;  %v659_v60 = vpop.permute.xlu0 %658 }
 0x1e6   :  { %v268_v59 = vsel %vm264_vm3, %v243_v58, 0.0  ;;  %v686_v3 = vsel %vm264_vm3, %v659_v60, 0.0 }
 0x1e7   :  { %269 = vadd.xlane.f32.xlu0 %v268_v59  ;;  %v1923_v59 = vmov 68  }
 0x1e9   :  { %v251_v61 = vpop.permute.xlu1 %250  ;;  %v241_v0 = vpop.permute.xlu0 %240 }
 0x1ea   :  { %v280_v62 = vsel %vm264_vm3, %v251_v61, 0.0  ;;  %v265_v6 = vsel %vm264_vm3, %v241_v0, 0.0 }
 0x1eb   :  { %281 = vadd.xlane.f32.xlu1 %v280_v62  ;;  %675 = vadd.xlane.f32.xlu0 %v674_v63  ;;  %v1924_v63 = vmov 65  }
 0x1ed   :  { %v657_v1 = vpop.permute.xlu1 %656  ;;  %v249_v7 = vpop.permute.xlu0 %248 }
 0x1ee   :  { %v683_v2 = vsel %vm264_vm3, %v657_v1, 0.0  ;;  %v277_v11 = vsel %vm264_vm3, %v249_v7, 0.0  ;;  %v1925_v1 = vmov 64  }
 0x1ef   :  { %684 = vadd.xlane.f32.xlu1 %v683_v2  ;;  %687 = vadd.xlane.f32.xlu0 %v686_v3  ;;  %v1926_v2 = vmov 66   ;;  %v1927_v3 = vmov 67  }
 0x1f1   :  { %v665_v4 = vpop.permute.xlu1 %664  ;;  %v663_v18 = vpop.permute.xlu0 %662 }
 0x1f2   :  { %v695_v5 = vsel %vm264_vm3, %v665_v4, 0.0  ;;  %v692_v25 = vsel %vm264_vm3, %v663_v18, 0.0 }
 0x1f3   :  { %696 = vadd.xlane.f32.xlu1 %v695_v5  ;;  %266 = vadd.xlane.f32.xlu0 %v265_v6 }
 0x1f5   :  { %v247_v8 = vpop.permute.xlu1 %246  ;;  %v245_v24 = vpop.permute.xlu0 %244 }
 0x1f6   :  { %v274_v10 = vsel %vm264_vm3, %v247_v8, 0.0  ;;  %v271_v26 = vsel %vm264_vm3, %v245_v24, 0.0 }
 0x1f7   :  { %275 = vadd.xlane.f32.xlu1 %v274_v10  ;;  %278 = vadd.xlane.f32.xlu0 %v277_v11 }
 0x1f9   :  { %v255_v13 = vpop.permute.xlu1 %254  ;;  %v253_v29 = vpop.permute.xlu0 %252 }
 0x1fa   :  { %v286_v14 = vsel %vm264_vm3, %v255_v13, 0.0  ;;  %v283_v32 = vsel %vm264_vm3, %v253_v29, 0.0 }
 0x1fb   :  { %287 = vadd.xlane.f32.xlu1 %v286_v14 }
 0x1fd   :  { %v655_v21 = vpop.permute.xlu1 %654 }
 0x1fe   :  { %v680_v23 = vsel %vm264_vm3, %v655_v21, 0.0 }
 0x1ff   :  { %681 = vadd.xlane.f32.xlu0 %v680_v23 }
 0x203   :  { %693 = vadd.xlane.f32.xlu0 %v692_v25 }
 0x207   :  { %272 = vadd.xlane.f32.xlu0 %v271_v26 }
 0x20b   :  { %284 = vadd.xlane.f32.xlu0 %v283_v32 }
 0x268   :  { %v679_v33 = vpop.xlane.xlu1 %678 }
 0x269   :  { %1822 = vrcp.f32 %v679_v33 }
 0x26c   :  { %v691_v34 = vpop.xlane.xlu1 %690 }
 0x26d   :  { %1824 = vrcp.f32 %v691_v34 }
 0x270   :  { %v270_v36 = vpop.xlane.xlu0 %269 }
 0x271   :  { %1826 = vrcp.f32 %v270_v36 }
 0x274   :  { %v282_v40 = vpop.xlane.xlu1 %281  ;;  %v676_v53 = vpop.xlane.xlu0 %675 }
 0x275   :  { %1828 = vrcp.f32 %v282_v40  ;;  %v2280_v40 = vmax.f32 %v2022_v16, 0.0 }
 0x276   :  { %v1823_v38 = vpop.eup %1822  ;;  %1830 = vrcp.f32 %v676_v53 }
 0x277   :  { %v707_v42 = vmul.f32 %v1823_v38, %v2078_v9 }
 0x278   :  { %v688_v56 = vpop.xlane.xlu0 %687  ;;  %v685_v60 = vpop.xlane.xlu1 %684 }
 0x279   :  { %767 = vperm.xlu1 %1731, %v707_v42  }
 0x27a   :  { %v1825_v44 = vpop.eup %1824 }
 0x27b   :  { %v711_v54 = vmul.f32 %v1825_v44, %v2083_v17 }
 0x27c   :  { %v267_v58 = vpop.xlane.xlu0 %266  ;;  %v697_v0 = vpop.xlane.xlu1 %696 }
 0x27d   :  { %1732 = vset.pattern.permute.xlu1 %v1921_v55  ;;  %783 = vperm.xlu0 %1734, %v711_v54   ;;  %1832 = vrcp.f32 %v267_v58 }
 0x27e   :  { %847 = vperm.xlu1 %1732, %v707_v42   ;;  %v1827_v9 = vpop.eup %1826  ;;  %1834 = vrcp.f32 %v685_v60  ;;  %v2309_v60 = vmax.f32 %v2026_v20, 0.0 }
 0x27f   :  { %v298_v62 = vmul.f32 %v1827_v9, %v2093_v28  ;;  %1836 = vrcp.f32 %v697_v0 }
 0x280   :  { %v276_v6 = vpop.xlane.xlu1 %275 }
 0x281   :  { %1735 = vset.pattern.permute.xlu0 %v1921_v55  ;;  %1838 = vrcp.f32 %v276_v6 }
 0x282   :  { %1733 = vset.pattern.permute.xlu1 %v1922_v57  ;;  %863 = vperm.xlu0 %1735, %v711_v54   ;;  %v1829_v17 = vpop.eup %1828  ;;  %1840 = vrcp.f32 %v688_v56 }
 0x283   :  { %927 = vperm.xlu1 %1733, %v707_v42   ;;  %v2173_v61 = vmul.f32 %v1829_v17, %v2102_v37  ;;  %v1831_v37 = vpop.eup %1830 }
 0x284   :  { %v2182_v28 = vmul.f32 %v1831_v37, %v2086_v19  ;;  %v279_v19 = vpop.xlane.xlu0 %278  ;;  %v288_v13 = vpop.xlane.xlu1 %287 }
 0x285   :  { %1842 = vrcp.f32 %v288_v13 }
 0x286   :  { %1737 = vset.pattern.permute.xlu0 %v1923_v59 }
 0x287   :  { %943 = vperm.xlu1 %1733, %v711_v54   ;;  %721 = vperm.xlu0 %1737, %v707_v42  }
 0x288   :  { %v2200_v10 = vpop.xlane.xlu0 %681 }
 0x28a   :  { %v1833_v4 = vpop.eup %1832 }
 0x28b   :  { %1736 = vset.pattern.permute.xlu1 %v1924_v63  ;;  %1740 = vset.pattern.permute.xlu0 %v1924_v63  ;;  %v2188_v5 = vmul.f32 %v1833_v4, %v2106_v41  ;;  %v1835_v7 = vpop.eup %1834 }
 0x28c   :  { %374 = vperm.xlu0 %1740, %v2173_v61   ;;  %358 = vperm.xlu1 %1736, %v298_v62   ;;  %v2194_v8 = vmul.f32 %v1835_v7, %v2112_v43  ;;  %v1837_v41 = vpop.eup %1836  ;;  %v694_v43 = vpop.xlane.xlu0 %693  ;;  %v2334_v7 = vmax.f32 %v2030_v22, 0.0 }
 0x28d   :  { %v2203_v11 = vmul.f32 %v1837_v41, %v2120_v46 }
 0x28e   :  { %v1839_v14 = vpop.eup %1838 }
 0x28f   :  { %v2214_v46 = vmul.f32 %v1839_v14, %v2128_v48  ;;  %v1841_v21 = vpop.eup %1840 }
 0x290   :  { %1744 = vset.pattern.permute.xlu0 %v1925_v1  ;;  %1738 = vset.pattern.permute.xlu1 %v1926_v2  ;;  %v273_v18 = vpop.xlane.xlu0 %272  ;;  %v710_v23 = vmul.f32 %v1841_v21, %v2096_v31 }
 0x291   :  { %312 = vperm.xlu0 %1744, %v298_v62   ;;  %438 = vperm.xlu1 %1738, %v298_v62   ;;  %1844 = vrcp.f32 %v273_v18  ;;  %v2357_v18 = vmax.f32 %v2042_v30, 0.0 }
 0x292   :  { %v1843_v24 = vpop.eup %1842 }
 0x293   :  { %v2225_v48 = vmul.f32 %v1843_v24, %v2136_v50 }
 0x294   :  { %v285_v25 = vpop.xlane.xlu0 %284 }
 0x295   :  { %1745 = vset.pattern.permute.xlu0 %v1920_v12  ;;  %1739 = vset.pattern.permute.xlu1 %v1927_v3  ;;  %1846 = vrcp.f32 %v285_v25 }
 0x296   :  { %518 = vperm.xlu1 %1739, %v298_v62   ;;  %763 = vperm.xlu0 %1745, %v2182_v28   ;;  %1848 = vrcp.f32 %v279_v19 }
 0x297   :  { %1850 = vrcp.f32 %v694_v43 }
 0x298   :  { %1852 = vrcp.f32 %v2200_v10 }
 0x29a   :  { %1741 = vset.pattern.permute.xlu1 %v1923_v59  ;;  %1751 = vset.pattern.permute.xlu0 %v1924_v63 }
 0x29b   :  { %741 = vperm.xlu1 %1741, %v711_v54   ;;  %354 = vperm.xlu0 %1751, %v2188_v5  }
 0x29e   :  { %v1845_v31 = vpop.eup %1844 }
 0x29f   :  { %1742 = vset.pattern.permute.xlu1 %v1926_v2  ;;  %1761 = vset.pattern.permute.xlu0 %v1921_v55  ;;  %v2234_v50 = vmul.f32 %v1845_v31, %v2130_v49 }
 0x2a0   :  { %454 = vperm.xlu1 %1742, %v2173_v61   ;;  %855 = vperm.xlu0 %1761, %v2194_v8  }
 0x2a2   :  { %v1847_v26 = vpop.eup %1846 }
 0x2a3   :  { %v2245_v49 = vmul.f32 %v1847_v26, %v2138_v51  ;;  %v1849_v29 = vpop.eup %1848 }
 0x2a4   :  { %1743 = vset.pattern.permute.xlu1 %v1927_v3  ;;  %1763 = vset.pattern.permute.xlu0 %v1920_v12  ;;  %v1851_v32 = vpop.eup %1850  ;;  %v301_v33 = vmul.f32 %v1849_v29, %v2114_v45 }
 0x2a5   :  { %534 = vperm.xlu1 %1743, %v2173_v61   ;;  %791 = vperm.xlu0 %1763, %v2203_v11   ;;  %v2253_v34 = vmul.f32 %v1851_v32, %v2122_v47  ;;  %v2273_v47 = vmax.f32 %v2020_v15, 0.0  ;;  %v1853_v62 = vpop.eup %1852 }
 0x2a9   :  { %1746 = vset.pattern.permute.xlu1 %v1921_v55  ;;  %1764 = vset.pattern.permute.xlu0 %v1921_v55 }
 0x2aa   :  { %843 = vperm.xlu1 %1746, %v2182_v28   ;;  %871 = vperm.xlu0 %1764, %v2203_v11  }
 0x2ae   :  { %1747 = vset.pattern.permute.xlu1 %v1922_v57  ;;  %1765 = vset.pattern.permute.xlu0 %v1924_v63 }
 0x2af   :  { %923 = vperm.xlu1 %1747, %v2182_v28   ;;  %366 = vperm.xlu0 %1765, %v2214_v46  }
 0x2b3   :  { %1748 = vset.pattern.permute.xlu1 %v1920_v12  ;;  %1766 = vset.pattern.permute.xlu0 %v1923_v59 }
 0x2b4   :  { %779 = vperm.xlu1 %1748, %v710_v23   ;;  %731 = vperm.xlu0 %1766, %v2194_v8  }
 0x2b8   :  { %1749 = vset.pattern.permute.xlu1 %v1921_v55  ;;  %1769 = vset.pattern.permute.xlu0 %v1924_v63 }
 0x2b9   :  { %859 = vperm.xlu1 %1749, %v710_v23   ;;  %382 = vperm.xlu0 %1769, %v2225_v48  }
 0x2bd   :  { %1750 = vset.pattern.permute.xlu1 %v1922_v57  ;;  %1772 = vset.pattern.permute.xlu0 %v1927_v3 }
 0x2be   :  { %939 = vperm.xlu1 %1750, %v710_v23   ;;  %542 = vperm.xlu0 %1772, %v2225_v48  }
 0x2c2   :  { %1752 = vset.pattern.permute.xlu1 %v1923_v59  ;;  %1780 = vset.pattern.permute.xlu0 %v1924_v63 }
 0x2c3   :  { %716 = vperm.xlu1 %1752, %v2182_v28   ;;  %362 = vperm.xlu0 %1780, %v2234_v50   ;;  %v708_v28 = vmul.f32 %v1853_v62, %v2144_v52 }
 0x2c7   :  { %1753 = vset.pattern.permute.xlu1 %v1926_v2  ;;  %1783 = vset.pattern.permute.xlu0 %v1927_v3 }
 0x2c8   :  { %434 = vperm.xlu1 %1753, %v2188_v5   ;;  %522 = vperm.xlu0 %1783, %v2234_v50  }
 0x2cc   :  { %1754 = vset.pattern.permute.xlu1 %v1927_v3  ;;  %1784 = vset.pattern.permute.xlu0 %v1924_v63 }
 0x2cd   :  { %514 = vperm.xlu1 %1754, %v2188_v5   ;;  %378 = vperm.xlu0 %1784, %v2245_v49  }
 0x2d1   :  { %1755 = vset.pattern.permute.xlu1 %v1924_v63  ;;  %1785 = vset.pattern.permute.xlu0 %v1923_v59 }
 0x2d2   :  { %370 = vperm.xlu1 %1755, %v301_v33   ;;  %746 = vperm.xlu0 %1785, %v2253_v34  }
 0x2d6   :  { %1756 = vset.pattern.permute.xlu1 %v1923_v59  ;;  %1786 = vset.pattern.permute.xlu0 %v1927_v3 }
 0x2d7   :  { %736 = vperm.xlu1 %1756, %v710_v23   ;;  %538 = vperm.xlu0 %1786, %v2245_v49  }
 0x2db   :  { %1757 = vset.pattern.permute.xlu1 %v1926_v2  ;;  %1788 = vset.pattern.permute.xlu0 %v1925_v1 }
 0x2dc   :  { %450 = vperm.xlu1 %1757, %v301_v33  }
 0x2e0   :  { %1758 = vset.pattern.permute.xlu1 %v1927_v3 }
 0x2e1   :  { %530 = vperm.xlu1 %1758, %v301_v33  }
 0x2e5   :  { %1759 = vset.pattern.permute.xlu1 %v1925_v1 }
 0x2e6   :  { %307 = vperm.xlu1 %1759, %v2188_v5  }
 0x2ea   :  { %327 = vperm.xlu1 %1759, %v301_v33  }
 0x2ee   :  { %1760 = vset.pattern.permute.xlu1 %v1920_v12 }
 0x2ef   :  { %775 = vperm.xlu1 %1760, %v2194_v8  }
 0x2f3   :  { %1762 = vset.pattern.permute.xlu1 %v1922_v57 }
 0x2f4   :  { %v2269_v45 = vpop.permute.xlu1 %767  ;;  %935 = vperm.xlu1 %1762, %v2194_v8  }
 0x2f5   :  { %v795_v21 = vmul.f32 %v2269_v45, %v2273_v47 }
 0x2f8   :  { %951 = vperm.xlu1 %1762, %v2203_v11   ;;  %v2276_v51 = vpop.permute.xlu0 %783 }
 0x2f9   :  { %v848_v36 = vpop.permute.xlu1 %847  ;;  %v799_v30 = vmul.f32 %v2276_v51, %v2280_v40 }
 0x2fa   :  { %v875_v38 = vmul.f32 %v848_v36, %v2273_v47 }
 0x2fc   :  { %1767 = vset.pattern.permute.xlu1 %v1926_v2  ;;  %892 = vrot.lane.b32.xlu0 %v875_v38, %s1928_s26 }
 0x2fd   :  { %446 = vperm.xlu1 %1767, %v2214_v46   ;;  %v864_v42 = vpop.permute.xlu0 %863 }
 0x2fe   :  { %v879_v15 = vmul.f32 %v864_v42, %v2280_v40  ;;  %v2286_v44 = vpop.permute.xlu1 %927 }
 0x300   :  { %900 = vrot.lane.b32.xlu0 %v879_v15, %s1928_s26 }
 0x301   :  { %1768 = vset.pattern.permute.xlu1 %v1927_v3 }
 0x302   :  { %v944_v53 = vpop.permute.xlu1 %943  ;;  %526 = vperm.xlu1 %1768, %v2214_v46   ;;  %v2291_v16 = vpop.permute.xlu0 %721 }
 0x303   :  { %v959_v54 = vmul.f32 %v944_v53, %v2280_v40 }
 0x305   :  { %980 = vrot.lane.b32.xlu0 %v959_v54, %s1929_s27 }
 0x306   :  { %1770 = vset.pattern.permute.xlu1 %v1923_v59 }
 0x307   :  { %v2297_v56 = vpop.permute.xlu1 %358  ;;  %751 = vperm.xlu1 %1770, %v2203_v11   ;;  %v2300_v9 = vpop.permute.xlu0 %374 }
 0x30b   :  { %1771 = vset.pattern.permute.xlu1 %v1926_v2 }
 0x30c   :  { %v2303_v58 = vpop.permute.xlu1 %438  ;;  %462 = vperm.xlu1 %1771, %v2225_v48   ;;  %v2306_v17 = vpop.permute.xlu0 %312 }
 0x310   :  { %1773 = vset.pattern.permute.xlu1 %v1925_v1 }
 0x311   :  { %v2312_v63 = vpop.permute.xlu1 %518  ;;  %322 = vperm.xlu1 %1773, %v2214_v46   ;;  %v764_v0 = vpop.permute.xlu0 %763 }
 0x312   :  { %v794_v37 = vmul.f32 %v764_v0, %v2309_v60 }
 0x314   :  { %810 = vrot.lane.b32.xlu0 %v794_v37, %s1930_s28 }
 0x315   :  { %1774 = vset.pattern.permute.xlu1 %v1920_v12 }
 0x316   :  { %v2319_v3 = vpop.permute.xlu1 %741  ;;  %771 = vperm.xlu1 %1774, %v708_v28   ;;  %v355_v8 = vpop.permute.xlu0 %354 }
 0x317   :  { %v385_v13 = vmul.f32 %v355_v8, %v2309_v60 }
 0x31a   :  { %1775 = vset.pattern.permute.xlu1 %v1921_v55 }
 0x31b   :  { %v2322_v20 = vpop.permute.xlu1 %454  ;;  %851 = vperm.xlu1 %1775, %v708_v28  }
 0x31f   :  { %1776 = vset.pattern.permute.xlu1 %v1922_v57 }
 0x320   :  { %v2325_v4 = vpop.permute.xlu1 %534  ;;  %931 = vperm.xlu1 %1776, %v708_v28  }
 0x324   :  { %1777 = vset.pattern.permute.xlu1 %v1920_v12 }
 0x325   :  { %v844_v5 = vpop.permute.xlu1 %843  ;;  %787 = vperm.xlu1 %1777, %v2253_v34  }
 0x326   :  { %v874_v52 = vmul.f32 %v844_v5, %v2309_v60 }
 0x328   :  { %890 = vrot.lane.b32.xlu0 %v874_v52, %s1928_s26  ;;  %v2409_v52 = vmax.f32 %v2056_v39, 0.0 }
 0x329   :  { %1778 = vset.pattern.permute.xlu1 %v1921_v55  ;;  %v856_v55 = vpop.permute.xlu0 %855 }
 0x32a   :  { %v924_v6 = vpop.permute.xlu1 %923  ;;  %867 = vperm.xlu1 %1778, %v2253_v34  }
 0x32b   :  { %v954_v25 = vmul.f32 %v924_v6, %v2309_v60 }
 0x32d   :  { %v792_v11 = vpop.permute.xlu0 %791 }
 0x32e   :  { %1779 = vset.pattern.permute.xlu1 %v1922_v57  ;;  %v801_v42 = vmul.f32 %v792_v11, %v2357_v18 }
 0x32f   :  { %v780_v19 = vpop.permute.xlu1 %779  ;;  %947 = vperm.xlu1 %1779, %v2253_v34  }
 0x330   :  { %v798_v12 = vmul.f32 %v780_v19, %v2334_v7 }
 0x331   :  { %v872_v14 = vpop.permute.xlu0 %871 }
 0x332   :  { %818 = vrot.lane.b32.xlu0 %v798_v12, %s1930_s28 }
 0x333   :  { %1781 = vset.pattern.permute.xlu1 %v1923_v59  ;;  %v2350_v59 = vmax.f32 %v2038_v27, 0.0  ;;  %v881_v27 = vmul.f32 %v872_v14, %v2357_v18 }
 0x334   :  { %v860_v41 = vpop.permute.xlu1 %859  ;;  %726 = vperm.xlu1 %1781, %v708_v28  }
 0x335   :  { %v367_v54 = vpop.permute.xlu0 %366 }
 0x338   :  { %1782 = vset.pattern.permute.xlu1 %v1926_v2  ;;  %v877_v2 = vmul.f32 %v856_v55, %v2350_v59  ;;  %v386_v55 = vmul.f32 %v2297_v56, %v2273_v47 }
 0x339   :  { %v940_v10 = vpop.permute.xlu1 %939  ;;  %442 = vperm.xlu1 %1782, %v2234_v50   ;;  %v2404_v37 = vpop.permute.xlu0 %731 }
 0x33a   :  { %v958_v22 = vmul.f32 %v940_v10, %v2334_v7 }
 0x33c   :  { %978 = vrot.lane.b32.xlu0 %v958_v22, %s1929_s27  ;;  %v2425_v22 = vmax.f32 %v2050_v35, 0.0  ;;  %v546_v35 = vmul.f32 %v2312_v63, %v2273_v47 }
 0x33d   :  { %458 = vperm.xlu1 %1782, %v2245_v49   ;;  %v383_v5 = vpop.permute.xlu0 %382 }
 0x33e   :  { %v2347_v43 = vpop.permute.xlu1 %716 }
 0x340   :  { %401 = vrot.lane.b32.xlu0 %v385_v13, %s1930_s28 }
 0x341   :  { %1787 = vset.pattern.permute.xlu1 %v1925_v1  ;;  %v955_v1 = vmul.f32 %v2286_v44, %v2273_v47  ;;  %v2412_v12 = vpop.permute.xlu0 %542 }
 0x342   :  { %317 = vperm.xlu1 %1787, %v2234_v50   ;;  %v878_v50 = vmul.f32 %v860_v41, %v2334_v7 }
 0x343   :  { %v435_v46 = vpop.permute.xlu1 %434 }
 0x344   :  { %896 = vrot.lane.b32.xlu0 %v877_v2, %s1928_s26  ;;  %v465_v11 = vmul.f32 %v435_v46, %v2309_v60 }
 0x345   :  { %v2417_v41 = vpop.permute.xlu0 %362 }
 0x346   :  { %812 = vrot.lane.b32.xlu1 %v795_v21, %s1930_s28 }
 0x348   :  { %v2366_v23 = vpop.permute.xlu1 %514  ;;  %904 = vrot.lane.b32.xlu0 %v881_v27, %s1928_s26 }
 0x349   :  { %v523_v13 = vpop.permute.xlu0 %522 }
 0x34a   :  { %972 = vrot.lane.b32.xlu1 %v955_v1, %s1929_s27 }
 0x34d   :  { %v2372_v24 = vpop.permute.xlu1 %370  ;;  %v2432_v21 = vpop.permute.xlu0 %378 }
 0x34e   :  { %820 = vrot.lane.b32.xlu1 %v799_v30, %s1930_s28  ;;  %v389_v63 = vmul.f32 %v2372_v24, %v2334_v7  ;;  %v388_v24 = vmul.f32 %v367_v54, %v2350_v59 }
 0x352   :  { %v2376_v31 = vpop.permute.xlu1 %736  ;;  %970 = vrot.lane.b32.xlu1 %v954_v25, %s1929_s27  ;;  %v2442_v25 = vpop.permute.xlu0 %746 }
 0x356   :  { %898 = vrot.lane.b32.xlu1 %v878_v50, %s1928_s26 }
 0x357   :  { %v2381_v26 = vpop.permute.xlu1 %450 }
 0x35c   :  { %v2383_v29 = vpop.permute.xlu1 %530 }
 0x361   :  { %v2385_v32 = vpop.permute.xlu1 %307 }
 0x365   :  { %v2387_v33 = vpop.permute.xlu1 %327 }
 0x36a   :  { %v776_v34 = vpop.permute.xlu1 %775 }
 0x36b   :  { %v797_v45 = vmul.f32 %v776_v34, %v2350_v59  ;;  %v390_v34 = vmul.f32 %v2300_v9, %v2280_v40  ;;  %v470_v9 = vmul.f32 %v2322_v20, %v2280_v40  ;;  %v549_v20 = vmul.f32 %v2383_v29, %v2334_v7 }
 0x36d   :  { %816 = vrot.lane.b32.xlu1 %v797_v45, %s1930_s28  ;;  %v545_v45 = vmul.f32 %v2366_v23, %v2309_v60 }
 0x36f   :  { %v936_v51 = vpop.permute.xlu1 %935 }
 0x370   :  { %v957_v36 = vmul.f32 %v936_v51, %v2350_v59 }
 0x372   :  { %976 = vrot.lane.b32.xlu1 %v957_v36, %s1929_s27  ;;  %v469_v36 = vmul.f32 %v2381_v26, %v2334_v7 }
 0x373   :  { %v952_v38 = vpop.permute.xlu1 %951 }
 0x374   :  { %v961_v15 = vmul.f32 %v952_v38, %v2357_v18 }
 0x376   :  { %824 = vrot.lane.b32.xlu1 %v801_v42, %s1930_s28  ;;  %984 = vrot.lane.b32.xlu0 %v961_v15, %s1929_s27  ;;  %v392_v15 = vmul.f32 %v383_v5, %v2357_v18 }
 0x378   :  { %v447_v44 = vpop.permute.xlu1 %446 }
 0x379   :  { %v468_v1 = vmul.f32 %v447_v44, %v2350_v59 }
 0x37a   :  { %332 = vperm.xlu1 %1787, %v2173_v61  }
 0x37d   :  { %v2398_v53 = vpop.permute.xlu1 %526 }
 0x37e   :  { %v548_v26 = vmul.f32 %v2398_v53, %v2350_v59 }
 0x382   :  { %v2400_v62 = vpop.permute.xlu1 %751 }
 0x387   :  { %v2402_v0 = vpop.permute.xlu1 %462 }
 0x38c   :  { %v2406_v28 = vpop.permute.xlu1 %322 }
 0x391   :  { %v772_v6 = vpop.permute.xlu1 %771 }
 0x392   :  { %v796_v19 = vmul.f32 %v772_v6, %v2409_v52  ;;  %v755_v6 = vmul.f32 %v2291_v16, %v2273_v47  ;;  %v547_v16 = vmul.f32 %v523_v13, %v2409_v52 }
 0x394   :  { %814 = vrot.lane.b32.xlu0 %v796_v19, %s1930_s28  ;;  %v550_v19 = vmul.f32 %v2325_v4, %v2280_v40  ;;  %v754_v4 = vmul.f32 %v2347_v43, %v2309_v60  ;;  %v1044_v43 = vld [vmem:[%s2797_s3 + $0x8] sm:$0xff] }
 0x396   :  { %v852_v61 = vpop.permute.xlu1 %851 }
 0x397   :  { %v876_v8 = vmul.f32 %v852_v61, %v2409_v52  ;;  %v387_v61 = vmul.f32 %v2417_v41, %v2409_v52 }
 0x399   :  { %894 = vrot.lane.b32.xlu0 %v876_v8, %s1928_s26 }
 0x39b   :  { %v932_v10 = vpop.permute.xlu1 %931 }
 0x39c   :  { %v956_v39 = vmul.f32 %v932_v10, %v2409_v52 }
 0x39d   :  { %403 = vrot.lane.b32.xlu0 %v386_v55, %s1930_s28 }
 0x39e   :  { %974 = vrot.lane.b32.xlu1 %v956_v39, %s1929_s27  ;;  %v1046_v39 = vld [vmem:[%s2797_s3 + $0x18] sm:$0xff] }
 0x39f   :  { %1672 = vmatprep.subr.mxu1 %v1046_v39 }
 0x3a0   :  { %v788_v2 = vpop.permute.xlu1 %787  ;;  %1673 = vmatpush3.msra.mxu1 %v1046_v39 }
 0x3a1   :  { %v800_v14 = vmul.f32 %v788_v2, %v2425_v22  ;;  %481 = vrot.lane.b32.xlu0 %v465_v11, %s1928_s26  ;;  %v1045_v11 = vld [vmem:[%s2797_s3 + $0x10] sm:$0xff]  ;;  %v391_v2 = vmul.f32 %v2432_v21, %v2425_v22 }
 0x3a2   :  { %1674 = vmatprep.subr.mxu1 %v1045_v11 }
 0x3a3   :  { %822 = vrot.lane.b32.xlu1 %v800_v14, %s1930_s28  ;;  %v758_v14 = vmul.f32 %v2376_v31, %v2334_v7  ;;  %1675 = vmatpush3.msra.mxu1 %v1045_v11  ;;  %v1043_v31 = vld [vmem:[%s2797_s3] sm:$0xff] }
 0x3a4   :  { %1676 = vmatprep.subr.mxu1 %v1044_v43 }
 0x3a5   :  { %v868_v56 = vpop.permute.xlu1 %867  ;;  %337 = vperm.xlu0 %1788, %v2245_v49   ;;  %v466_v49 = vmul.f32 %v2303_v58, %v2273_v47  ;;  %1677 = vmatpush3.msra.mxu1 %v1044_v43 }
 0x3a6   :  { %v880_v27 = vmul.f32 %v868_v56, %v2425_v22  ;;  %1678 = vmatprep.subr.mxu1 %v1043_v31 }
 0x3a7   :  { %1679 = vmatpush3.msra.mxu1 %v1043_v31 }
 0x3a8   :  { %902 = vrot.lane.b32.xlu1 %v880_v27, %s1928_s26 }
 0x3a9   :  { %563 = vrot.lane.b32.xlu0 %v546_v35, %s1929_s27 }
 0x3aa   :  { %v948_v46 = vpop.permute.xlu1 %947  ;;  %1789 = vset.pattern.permute.xlu0 %v1922_v57  ;;  %v2454_v57 = vpop.permute.xlu0 %538 }
 0x3ab   :  { %v960_v30 = vmul.f32 %v948_v46, %v2425_v22 }
 0x3ad   :  { %982 = vrot.lane.b32.xlu1 %v960_v30, %s1929_s27  ;;  %487 = vrot.lane.b32.xlu0 %v468_v1, %s1928_s26 }
 0x3ae   :  { %v893_v58 = vpop.permute.xlu0 %892 }
 0x3af   :  { %v2450_v50 = vpop.permute.xlu1 %726 }
 0x3b1   :  { %483 = vrot.lane.b32.xlu1 %v466_v49, %s1928_s26  ;;  %409 = vrot.lane.b32.xlu0 %v389_v63, %s1930_s28 }
 0x3b2   :  { %v2469_v23 = vpop.permute.xlu0 %900 }
 0x3b4   :  { %v443_v51 = vpop.permute.xlu1 %442 }
 0x3b5   :  { %561 = vrot.lane.b32.xlu1 %v545_v45, %s1929_s27  ;;  %411 = vrot.lane.b32.xlu0 %v390_v34, %s1930_s28  ;;  %v467_v55 = vmul.f32 %v443_v51, %v2409_v52  ;;  %v551_v34 = vmul.f32 %v2454_v57, %v2425_v22 }
 0x3b6   :  { %v2480_v54 = vpop.permute.xlu0 %980 }
 0x3b8   :  { %v459_v38 = vpop.permute.xlu1 %458 }
 0x3b9   :  { %407 = vrot.lane.b32.xlu1 %v388_v24, %s1930_s28  ;;  %489 = vrot.lane.b32.xlu0 %v469_v36, %s1928_s26  ;;  %v471_v21 = vmul.f32 %v459_v38, %v2425_v22 }
 0x3ba   :  { %v811_v53 = vpop.permute.xlu0 %810 }
 0x3bb   :  { %v834_v56 = vadd.f32 %v811_v53, %v754_v4 }
 0x3bd   :  { %v2471_v42 = vpop.permute.xlu1 %317  ;;  %342 = vperm.xlu1 %1787, %v2225_v48   ;;  %491 = vrot.lane.b32.xlu0 %v470_v9, %s1928_s26  ;;  %v472_v48 = vmul.f32 %v2402_v0, %v2357_v18 }
 0x3be   :  { %v891_v0 = vpop.permute.xlu0 %890 }
 0x3bf   :  { %v914_v35 = vadd.f32 %v891_v0, %v834_v56 }
 0x3c1   :  { %v813_v44 = vpop.permute.xlu1 %812  ;;  %567 = vrot.lane.b32.xlu1 %v548_v26, %s1929_s27  ;;  %415 = vrot.lane.b32.xlu0 %v392_v15, %s1930_s28 }
 0x3c2   :  { %v835_v8 = vadd.f32 %v813_v44, %v755_v6  ;;  %v819_v13 = vpop.permute.xlu0 %818  ;;  %v759_v6 = vmul.f32 %v2319_v3, %v2280_v40 }
 0x3c3   :  { %v838_v46 = vadd.f32 %v819_v13, %v758_v14 }
 0x3c4   :  { %v915_v10 = vadd.f32 %v893_v58, %v835_v8  ;;  %v757_v58 = vmul.f32 %v2404_v37, %v2350_v59 }
 0x3c5   :  { %v973_v5 = vpop.permute.xlu1 %972  ;;  %569 = vrot.lane.b32.xlu1 %v549_v20, %s1929_s27  ;;  %495 = vrot.lane.b32.xlu0 %v472_v48, %s1928_s26 }
 0x3c6   :  { %v995_v27 = vadd.f32 %v973_v5, %v915_v10  ;;  %v979_v63 = vpop.permute.xlu0 %978  ;;  %v756_v5 = vmul.f32 %v2450_v50, %v2409_v52  ;;  %v761_v10 = vmul.f32 %v2400_v62, %v2357_v18  ;;  %v552_v50 = vmul.f32 %v2412_v12, %v2357_v18 }
 0x3c9   :  { %v821_v29 = vpop.permute.xlu1 %820  ;;  %571 = vrot.lane.b32.xlu1 %v550_v19, %s1929_s27  ;;  %405 = vrot.lane.b32.xlu0 %v387_v61, %s1930_s28 }
 0x3ca   :  { %v2527_v51 = vpop.permute.xlu0 %401  ;;  %v839_v19 = vadd.f32 %v821_v29, %v759_v6 }
 0x3cd   :  { %v971_v41 = vpop.permute.xlu1 %970  ;;  %565 = vrot.lane.b32.xlu1 %v547_v16, %s1929_s27  ;;  %485 = vrot.lane.b32.xlu0 %v467_v55, %s1928_s26  ;;  %v919_v16 = vadd.f32 %v2469_v23, %v839_v19  ;;  %v760_v23 = vmul.f32 %v2442_v25, %v2425_v22 }
 0x3ce   :  { %v994_v30 = vadd.f32 %v971_v41, %v914_v35  ;;  %v897_v38 = vpop.permute.xlu0 %896 }
 0x3cf   :  { %v999_v39 = vadd.f32 %v2480_v54, %v919_v16 }
 0x3d1   :  { %v899_v1 = vpop.permute.xlu1 %898  ;;  %1012 = vrot.lane.b32.xlu1 %v995_v27, %s1931_s12  ;;  %413 = vrot.lane.b32.xlu0 %v391_v2, %s1930_s28 }
 0x3d2   :  { %v918_v49 = vadd.f32 %v899_v1, %v838_v46  ;;  %v905_v44 = vpop.permute.xlu0 %904 }
 0x3d4   :  { %v998_v45 = vadd.f32 %v979_v63, %v918_v49 }
 0x3d5   :  { %1010 = vrot.lane.b32.xlu1 %v994_v30, %s1931_s12  ;;  %493 = vrot.lane.b32.xlu0 %v471_v21, %s1928_s26  ;;  %v348_v21 = vmul.f32 %v2406_v28, %v2350_v59  ;;  %v346_v28 = vmul.f32 %v2306_v17, %v2273_v47 }
 0x3d9   :  { %1018 = vrot.lane.b32.xlu1 %v998_v45, %s1931_s12  ;;  %573 = vrot.lane.b32.xlu0 %v551_v34, %s1929_s27  ;;  %v349_v34 = vmul.f32 %v2387_v33, %v2334_v7  ;;  %v345_v7 = vmul.f32 %v2385_v32, %v2309_v60 }
 0x3df   :  { %v817_v24 = vpop.permute.xlu1 %816 }
 0x3e0   :  { %v837_v36 = vadd.f32 %v817_v24, %v757_v58 }
 0x3e2   :  { %v917_v9 = vadd.f32 %v897_v38, %v837_v36 }
 0x3e4   :  { %v977_v15 = vpop.permute.xlu1 %976 }
 0x3e5   :  { %v997_v26 = vadd.f32 %v977_v15, %v917_v9 }
 0x3e7   :  { %1016 = vrot.lane.b32.xlu1 %v997_v26, %s1931_s12 }
 0x3e8   :  { %v985_v57 = vpop.permute.xlu0 %984  ;;  %v825_v48 = vpop.permute.xlu1 %824 }
 0x3e9   :  { %v841_v3 = vadd.f32 %v825_v48, %v761_v10 }
 0x3eb   :  { %v921_v29 = vadd.f32 %v905_v44, %v841_v3 }
 0x3ed   :  { %v1001_v2 = vadd.f32 %v985_v57, %v921_v29 }
 0x3f5   :  { %v333_v53 = vpop.permute.xlu1 %332 }
 0x3f6   :  { %v350_v38 = vmul.f32 %v333_v53, %v2280_v40 }
 0x406   :  { %v815_v20 = vpop.permute.xlu0 %814 }
 0x407   :  { %v836_v61 = vadd.f32 %v815_v20, %v756_v5  ;;  %v425_v5 = vadd.f32 %v2527_v51, %v345_v7  ;;  %v347_v51 = vmul.f32 %v2471_v42, %v2409_v52 }
 0x40b   :  { %v895_v37 = vpop.permute.xlu0 %894 }
 0x40c   :  { %v916_v8 = vadd.f32 %v895_v37, %v836_v61 }
 0x40f   :  { %v404_v41 = vpop.permute.xlu0 %403 }
 0x410   :  { %v975_v0 = vpop.permute.xlu1 %974  ;;  %v426_v33 = vadd.f32 %v404_v41, %v346_v28 }
 0x411   :  { %v996_v55 = vadd.f32 %v975_v0, %v916_v8 }
 0x413   :  { %1014 = vrot.lane.b32.xlu1 %v996_v55, %s1931_s12  ;;  %v482_v62 = vpop.permute.xlu0 %481 }
 0x414   :  { %v505_v53 = vadd.f32 %v482_v62, %v425_v5 }
 0x415   :  { %v823_v4 = vpop.permute.xlu1 %822 }
 0x416   :  { %v840_v13 = vadd.f32 %v823_v4, %v760_v23 }
 0x417   :  { %1020 = vrot.lane.b32.xlu1 %v999_v39, %s1931_s12 }
 0x41a   :  { %v903_v11 = vpop.permute.xlu1 %902 }
 0x41b   :  { %575 = vrot.lane.b32.xlu1 %v552_v50, %s1929_s27  ;;  %v920_v14 = vadd.f32 %v903_v11, %v840_v13 }
 0x41f   :  { %v983_v54 = vpop.permute.xlu1 %982  ;;  %1024 = vrot.lane.b32.xlu1 %v1001_v2, %s1931_s12 }
 0x420   :  { %v1000_v56 = vadd.f32 %v983_v54, %v920_v14  ;;  %v2548_v27 = vpop.permute.xlu0 %337 }
 0x421   :  { %v351_v13 = vmul.f32 %v2548_v27, %v2425_v22  ;;  %v1191_v22 = vld [vmem:[%s2798_s5] sm:$0xff] }
 0x422   :  { %1022 = vrot.lane.b32.xlu0 %v1000_v56, %s1931_s12  ;;  %v1600_v27 = vld [vmem:[%s2799_s4] ss:$0 sm:$0xff] }
 0x423   :  { %v484_v43 = vpop.permute.xlu1 %483 }
 0x424   :  { %v564_v12 = vpop.permute.xlu0 %563  ;;  %v506_v37 = vadd.f32 %v484_v43, %v426_v33 }
 0x426   :  { %v586_v61 = vadd.f32 %v564_v12, %v506_v37 }
 0x427   :  { %v562_v46 = vpop.permute.xlu1 %561 }
 0x428   :  { %v488_v35 = vpop.permute.xlu0 %487  ;;  %v585_v19 = vadd.f32 %v562_v46, %v505_v53 }
 0x42b   :  { %v408_v1 = vpop.permute.xlu1 %407 }
 0x42c   :  { %v410_v25 = vpop.permute.xlu0 %409  ;;  %v428_v30 = vadd.f32 %v408_v1, %v348_v21 }
 0x42d   :  { %v429_v24 = vadd.f32 %v410_v25, %v349_v34 }
 0x42e   :  { %v508_v45 = vadd.f32 %v488_v35, %v428_v30 }
 0x430   :  { %v412_v31 = vpop.permute.xlu0 %411 }
 0x431   :  { %v430_v44 = vadd.f32 %v412_v31, %v350_v38 }
 0x434   :  { %v490_v63 = vpop.permute.xlu0 %489 }
 0x435   :  { %v509_v9 = vadd.f32 %v490_v63, %v429_v24 }
 0x438   :  { %v343_v49 = vpop.permute.xlu1 %342  ;;  %v492_v15 = vpop.permute.xlu0 %491 }
 0x439   :  { %v510_v20 = vadd.f32 %v492_v15, %v430_v44  ;;  %v352_v14 = vmul.f32 %v343_v49, %v2357_v18  ;;  %v1192_v18 = vld [vmem:[%s2798_s5 + $0x8] sm:$0xff] }
 0x43a   :  { %1692 = vmatprep.subr.mxu0 %v1192_v18 }
 0x43b   :  { %1693 = vmatpush3.msra.mxu0 %v1192_v18 }
 0x43c   :  { %v568_v58 = vpop.permute.xlu1 %567  ;;  %v416_v47 = vpop.permute.xlu0 %415  ;;  %1694 = vmatprep.subr.mxu0 %v1191_v22 }
 0x43d   :  { %v588_v36 = vadd.f32 %v568_v58, %v508_v45  ;;  %v432_v56 = vadd.f32 %v416_v47, %v352_v14  ;;  %1695 = vmatpush3.msra.mxu0 %v1191_v22 }
 0x440   :  { %v570_v26 = vpop.permute.xlu1 %569  ;;  %v496_v17 = vpop.permute.xlu0 %495 }
 0x441   :  { %v589_v57 = vadd.f32 %v570_v26, %v509_v9  ;;  %v512_v35 = vadd.f32 %v496_v17, %v432_v56 }
 0x444   :  { %v572_v48 = vpop.permute.xlu1 %571  ;;  %v406_v60 = vpop.permute.xlu0 %405 }
 0x445   :  { %v590_v59 = vadd.f32 %v572_v48, %v510_v20  ;;  %v427_v10 = vadd.f32 %v406_v60, %v347_v51 }
 0x448   :  { %v566_v6 = vpop.permute.xlu1 %565  ;;  %v486_v55 = vpop.permute.xlu0 %485 }
 0x449   :  { %v507_v39 = vadd.f32 %v486_v55, %v427_v10 }
 0x44b   :  { %v587_v4 = vadd.f32 %v566_v6, %v507_v39 }
 0x44c   :  { %v1013_v40 = vpop.permute.xlu1 %1012  ;;  %v414_v41 = vpop.permute.xlu0 %413 }
 0x44d   :  { %v1036_v16 = vsel %vm1034_vm4, %v586_v61, %v1013_v40  ;;  %v431_v54 = vadd.f32 %v414_v41, %v351_v13 }
 0x450   :  { %v1011_v8 = vpop.permute.xlu1 %1010  ;;  %v494_v52 = vpop.permute.xlu0 %493 }
 0x451   :  { %v1035_v0 = vsel %vm1034_vm4, %v585_v19, %v1011_v8  ;;  %v511_v43 = vadd.f32 %v494_v52, %v431_v54  ;;  %v1609_v19 = vld [vmem:[%s2800_s6] ss:$0 sm:$0xff]  ;;  %s1932_s6 = smov 126  }
 0x452   :  { %1680 = vmatprep.mubr.msk.f32.mxu1 %vm45_vm0, %v1035_v0 }
 0x453   :  { %1681 = vmatmul.mubr.msk.f32.vlgmr.msra.gmra.mxu1 %vm45_vm0, %v1036_v16 }
 0x454   :  { %v1019_v32 = vpop.permute.xlu1 %1018  ;;  %v574_v12 = vpop.permute.xlu0 %573 }
 0x455   :  { %v1039_v11 = vsel %vm1034_vm4, %v589_v57, %v1019_v32  ;;  %v591_v46 = vadd.f32 %v574_v12, %v511_v43 }
 0x459   :  { %v1017_v3 = vpop.permute.xlu1 %1016 }
 0x45a   :  { %v1038_v23 = vsel %vm1034_vm4, %v588_v36, %v1017_v3 }
 0x485   :  { %v1015_v50 = vpop.permute.xlu1 %1014 }
 0x486   :  { %v1037_v29 = vsel %vm1034_vm4, %v587_v4, %v1015_v50 }
 0x487   :  { %1683 = vmatprep.mubr.msk.f32.mxu1 %vm45_vm0, %v1037_v29 }
 0x488   :  { %1684 = vmatmul.mubr.msk.f32.gmra.mxu1 %vm45_vm0, %v1038_v23 }
 0x489   :  { %v1021_v62 = vpop.permute.xlu1 %1020  ;;  %1686 = vmatprep.mubr.msk.f32.mxu1 %vm45_vm0, %v1039_v11 }
 0x48a   :  { %v1040_v42 = vsel %vm1034_vm4, %v590_v59, %v1021_v62 }
 0x48c   :  { %1687 = vmatmul.mubr.msk.f32.gmra.mxu1 %vm45_vm0, %v1040_v42 }
 0x48d   :  { %v576_v2 = vpop.permute.xlu1 %575 }
 0x48e   :  { %v592_v1 = vadd.f32 %v576_v2, %v512_v35 }
 0x491   :  { %v1025_v25 = vpop.permute.xlu1 %1024 }
 0x492   :  { %v1042_v30 = vsel %vm1034_vm4, %v592_v1, %v1025_v25 }
 0x494   :  { %v1023_v31 = vpop.permute.xlu0 %1022 }
 0x495   :  { %v1041_v21 = vsel %vm1034_vm4, %v591_v46, %v1023_v31 }
 0x496   :  { %1689 = vmatprep.mubr.msk.f32.mxu1 %vm45_vm0, %v1041_v21 }
 0x497   :  { %1690 = vmatmul.mubr.msk.f32.gmra.mxu1 %vm45_vm0, %v1042_v30 }
 0x513   :  { %v1682_v49 = vpop.f32.mrf.mxu1 }
 0x514   :  { %v1150_v63 = vadd.f32 %v1682_v49, %v1600_v27 }
 0x515   :  { %v1144_v34 = vpop.f32.mrf.mxu1 }
 0x516   :  { %v1145_v45 = vadd.f32 %v1600_v27, %v1144_v34  ;;  %v1184_v24 = vmax.f32 %v1150_v63, 0.0 }
 0x518   :  { %v1183_v58 = vmax.f32 %v1145_v45, 0.0 }
 0x51a   :  { %1696 = vmatprep.mubr.msk.f32.mxu0 %vm1034_vm4, %v1183_v58 }
 0x51b   :  { %1697 = vmatmul.mubr.msk.f32.vlgmr.msra.gmra.mxu0 %vm1034_vm4, %v1184_v24 }
 0x548   :  { %v1685_v36 = vpop.f32.mrf.mxu1 }
 0x549   :  { %v1160_v38 = vadd.f32 %v1685_v36, %v1600_v27 }
 0x54a   :  { %v1154_v9 = vpop.f32.mrf.mxu1 }
 0x54b   :  { %v1155_v15 = vadd.f32 %v1600_v27, %v1154_v9  ;;  %v1186_v57 = vmax.f32 %v1160_v38, 0.0 }
 0x54c   :  { %v1688_v26 = vpop.f32.mrf.mxu1 }
 0x54d   :  { %v1185_v44 = vmax.f32 %v1155_v15, 0.0  ;;  %v1170_v20 = vadd.f32 %v1688_v26, %v1600_v27 }
 0x54e   :  { %v1164_v48 = vpop.f32.mrf.mxu1 }
 0x54f   :  { %v1165_v59 = vadd.f32 %v1600_v27, %v1164_v48  ;;  %1699 = vmatprep.mubr.msk.f32.mxu0 %vm1034_vm4, %v1185_v44  ;;  %v1188_v6 = vmax.f32 %v1170_v20, 0.0 }
 0x550   :  { %1700 = vmatmul.mubr.msk.f32.gmra.mxu0 %vm1034_vm4, %v1186_v57 }
 0x551   :  { %v1187_v28 = vmax.f32 %v1165_v59, 0.0 }
 0x553   :  { %1702 = vmatprep.mubr.msk.f32.mxu0 %vm1034_vm4, %v1187_v28 }
 0x554   :  { %1703 = vmatmul.mubr.msk.f32.gmra.mxu0 %vm1034_vm4, %v1188_v6 }
 0x557   :  { %v1691_v7 = vpop.f32.mrf.mxu1 }
 0x558   :  { %v1180_v33 = vadd.f32 %v1691_v7, %v1600_v27 }
 0x559   :  { %v1174_v5 = vpop.f32.mrf.mxu1 }
 0x55a   :  { %v1175_v37 = vadd.f32 %v1600_v27, %v1174_v5  ;;  %v1190_v53 = vmax.f32 %v1180_v33, 0.0 }
 0x55c   :  { %v1189_v40 = vmax.f32 %v1175_v37, 0.0 }
 0x55e   :  { %1705 = vmatprep.mubr.msk.f32.mxu0 %vm1034_vm4, %v1189_v40 }
 0x55f   :  { %1706 = vmatmul.mubr.msk.f32.gmra.mxu0 %vm1034_vm4, %v1190_v53 }
 0x5db   :  { %v1698_v61 = vpop.f32.mrf.mxu0 }
 0x5dc   :  { %v2602_v8 = vadd.f32 %v1698_v61, %v1609_v19 }
 0x5dd   :  { %v1290_v0 = vpop.f32.mrf.mxu0 }
 0x5de   :  { %v2604_v16 = vadd.f32 %v1609_v19, %v1290_v0  ;;  %v1438_v47 = vsel %vm1434_vm5, %v2602_v8, -inf  ;;  %v1333_v14 = vsel %vm1329_vm6, %v2602_v8, -inf }
 0x5df   :  { %1439 = vmax.xlane.f32.xlu1 %v1438_v47 }
 0x5e0   :  { %v1435_v17 = vsel %vm1434_vm5, %v2604_v16, -inf  ;;  %v1330_v54 = vsel %vm1329_vm6, %v2604_v16, -inf }
 0x5e1   :  { %1436 = vmax.xlane.f32.xlu0 %v1435_v17 }
 0x610   :  { %v1701_v60 = vpop.f32.mrf.mxu0 }
 0x611   :  { %v2610_v32 = vadd.f32 %v1701_v60, %v1609_v19 }
 0x612   :  { %v1300_v51 = vpop.f32.mrf.mxu0 }
 0x613   :  { %v2612_v55 = vadd.f32 %v1609_v19, %v1300_v51  ;;  %v1444_v10 = vsel %vm1434_vm5, %v2610_v32, -inf  ;;  %v1339_v56 = vsel %vm1329_vm6, %v2610_v32, -inf }
 0x614   :  { %v1704_v39 = vpop.f32.mrf.mxu0  ;;  %1445 = vmax.xlane.f32.xlu0 %v1444_v10 }
 0x615   :  { %v2616_v4 = vadd.f32 %v1704_v39, %v1609_v19  ;;  %v1441_v50 = vsel %vm1434_vm5, %v2612_v55, -inf  ;;  %v1336_v12 = vsel %vm1329_vm6, %v2612_v55, -inf }
 0x616   :  { %v1310_v3 = vpop.f32.mrf.mxu0 }
 0x617   :  { %v2618_v41 = vadd.f32 %v1609_v19, %v1310_v3  ;;  %v1450_v23 = vsel %vm1434_vm5, %v2616_v4, -inf  ;;  %v1345_v43 = vsel %vm1329_vm6, %v2616_v4, -inf }
 0x618   :  { %1442 = vmax.xlane.f32.xlu0 %v1441_v50 }
 0x619   :  { %v1447_v29 = vsel %vm1434_vm5, %v2618_v41, -inf  ;;  %v1342_v35 = vsel %vm1329_vm6, %v2618_v41, -inf }
 0x61a   :  { %1448 = vmax.xlane.f32.xlu1 %v1447_v29 }
 0x61c   :  { %1451 = vmax.xlane.f32.xlu0 %v1450_v23 }
 0x61f   :  { %v1707_v11 = vpop.f32.mrf.mxu0 }
 0x620   :  { %v2626_v62 = vadd.f32 %v1707_v11, %v1609_v19 }
 0x621   :  { %v1320_v52 = vpop.f32.mrf.mxu0 }
 0x622   :  { %v2628_v42 = vadd.f32 %v1609_v19, %v1320_v52  ;;  %v1456_v13 = vsel %vm1434_vm5, %v2626_v62, -inf  ;;  %v1351_v46 = vsel %vm1329_vm6, %v2626_v62, -inf }
 0x623   :  { %1457 = vmax.xlane.f32.xlu0 %v1456_v13 }
 0x624   :  { %v1453_v2 = vsel %vm1434_vm5, %v2628_v42, -inf  ;;  %v1348_v25 = vsel %vm1329_vm6, %v2628_v42, -inf }
 0x625   :  { %1454 = vmax.xlane.f32.xlu1 %v1453_v2 }
 0x627   :  { %1334 = vmax.xlane.f32.xlu0 %v1333_v14 }
 0x629   :  { %1331 = vmax.xlane.f32.xlu1 %v1330_v54 }
 0x62b   :  { %1340 = vmax.xlane.f32.xlu0 %v1339_v56 }
 0x62d   :  { %1337 = vmax.xlane.f32.xlu1 %v1336_v12 }
 0x62f   :  { %1346 = vmax.xlane.f32.xlu0 %v1345_v43 }
 0x631   :  { %1343 = vmax.xlane.f32.xlu1 %v1342_v35 }
 0x633   :  { %1352 = vmax.xlane.f32.xlu0 %v1351_v46 }
 0x635   :  { %1349 = vmax.xlane.f32.xlu1 %v1348_v25 }
 0x668   :  { %v1440_v1 = vpop.xlane.xlu1 %1439 }
 0x669   :  { %v1460_v31 = vsub.f32 %v2602_v8, %v1440_v1 }
 0x66a   :  { %v1437_v21 = vpop.xlane.xlu0 %1436 }
 0x66b   :  { %v1469_v30 = vmul.f32 1.442695, %v1460_v31  ;;  %v1459_v18 = vsub.f32 %v2604_v16, %v1437_v21 }
 0x66d   :  { %1854 = vpow2.f32 %v1469_v30  ;;  %v1467_v22 = vmul.f32 1.442695, %v1459_v18 }
 0x66f   :  { %1856 = vpow2.f32 %v1467_v22 }
 0x67a   :  { %v2652_v27 = vpop.eup %1854 }
 0x67b   :  { %1493 = vrot.lane.b32.xlu0 %v2652_v27, %s1932_s6 }
 0x67c   :  { %v2656_v49 = vpop.eup %1856 }
 0x67d   :  { %1491 = vrot.lane.b32.xlu1 %v2656_v49, %s1932_s6 }
 0x69d   :  { %v1446_v63 = vpop.xlane.xlu0 %1445 }
 0x69e   :  { %v1462_v34 = vsub.f32 %v2610_v32, %v1446_v63 }
 0x6a0   :  { %v1473_v45 = vmul.f32 1.442695, %v1462_v34 }
 0x6a1   :  { %v1443_v58 = vpop.xlane.xlu0 %1442 }
 0x6a2   :  { %1858 = vpow2.f32 %v1473_v45  ;;  %v1461_v24 = vsub.f32 %v2612_v55, %v1443_v58 }
 0x6a3   :  { %v1449_v36 = vpop.xlane.xlu1 %1448 }
 0x6a4   :  { %v1471_v38 = vmul.f32 1.442695, %v1461_v24  ;;  %v1463_v9 = vsub.f32 %v2618_v41, %v1449_v36 }
 0x6a5   :  { %v1452_v15 = vpop.xlane.xlu0 %1451 }
 0x6a6   :  { %1860 = vpow2.f32 %v1471_v38  ;;  %v1475_v26 = vmul.f32 1.442695, %v1463_v9  ;;  %v1464_v44 = vsub.f32 %v2616_v4, %v1452_v15 }
 0x6a8   :  { %1862 = vpow2.f32 %v1475_v26  ;;  %v1477_v57 = vmul.f32 1.442695, %v1464_v44 }
 0x6aa   :  { %1864 = vpow2.f32 %v1477_v57 }
 0x6ac   :  { %v1458_v20 = vpop.xlane.xlu0 %1457 }
 0x6ad   :  { %v1466_v48 = vsub.f32 %v2626_v62, %v1458_v20 }
 0x6ae   :  { %v1455_v59 = vpop.xlane.xlu1 %1454 }
 0x6af   :  { %v2665_v28 = vpop.eup %1858  ;;  %v1481_v6 = vmul.f32 1.442695, %v1466_v48  ;;  %v1465_v7 = vsub.f32 %v2628_v42, %v1455_v59 }
 0x6b0   :  { %1497 = vrot.lane.b32.xlu1 %v2665_v28, %s1932_s6  ;;  %v1335_v0 = vpop.xlane.xlu0 %1334 }
 0x6b1   :  { %1866 = vpow2.f32 %v1481_v6  ;;  %v1479_v33 = vmul.f32 1.442695, %v1465_v7  ;;  %v1355_v10 = vsub.f32 %v2602_v8, %v1335_v0 }
 0x6b2   :  { %v1332_v53 = vpop.xlane.xlu1 %1331 }
 0x6b3   :  { %v2670_v5 = vpop.eup %1860  ;;  %1868 = vpow2.f32 %v1479_v33  ;;  %v1354_v17 = vsub.f32 %v2604_v16, %v1332_v53  ;;  %v1364_v50 = vmul.f32 1.442695, %v1355_v10 }
 0x6b4   :  { %1495 = vrot.lane.b32.xlu1 %v2670_v5, %s1932_s6  ;;  %v1341_v60 = vpop.xlane.xlu0 %1340 }
 0x6b5   :  { %v2674_v37 = vpop.eup %1862  ;;  %v1362_v39 = vmul.f32 1.442695, %v1354_v17  ;;  %v1357_v11 = vsub.f32 %v2610_v32, %v1341_v60 }
 0x6b6   :  { %1499 = vrot.lane.b32.xlu0 %v2674_v37, %s1932_s6  ;;  %v1338_v47 = vpop.xlane.xlu1 %1337 }
 0x6b7   :  { %v2678_v40 = vpop.eup %1864  ;;  %v1356_v3 = vsub.f32 %v2612_v55, %v1338_v47  ;;  %1870 = vpow2.f32 %v1362_v39  ;;  %v1368_v14 = vmul.f32 1.442695, %v1357_v11 }
 0x6b8   :  { %1501 = vrot.lane.b32.xlu1 %v2678_v40, %s1932_s6  ;;  %v1347_v29 = vpop.xlane.xlu0 %1346  ;;  %1872 = vpow2.f32 %v1364_v50 }
 0x6b9   :  { %v1366_v52 = vmul.f32 1.442695, %v1356_v3  ;;  %v1359_v8 = vsub.f32 %v2616_v4, %v1347_v29 }
 0x6ba   :  { %v1344_v51 = vpop.xlane.xlu1 %1343 }
 0x6bb   :  { %v1358_v23 = vsub.f32 %v2618_v41, %v1344_v51  ;;  %1874 = vpow2.f32 %v1366_v52  ;;  %v1372_v56 = vmul.f32 1.442695, %v1359_v8 }
 0x6bc   :  { %v1353_v54 = vpop.xlane.xlu0 %1352 }
 0x6bd   :  { %v1370_v2 = vmul.f32 1.442695, %v1358_v23  ;;  %v1361_v41 = vsub.f32 %v2626_v62, %v1353_v54 }
 0x6be   :  { %v2682_v19 = vpop.eup %1866  ;;  %v1350_v13 = vpop.xlane.xlu1 %1349 }
 0x6bf   :  { %1505 = vrot.lane.b32.xlu1 %v2682_v19, %s1932_s6  ;;  %v1360_v16 = vsub.f32 %v2628_v42, %v1350_v13  ;;  %1876 = vpow2.f32 %v1370_v2  ;;  %v1376_v32 = vmul.f32 1.442695, %v1361_v41 }
 0x6c0   :  { %v2686_v61 = vpop.eup %1868  ;;  %1878 = vpow2.f32 %v1368_v14 }
 0x6c1   :  { %1503 = vrot.lane.b32.xlu0 %v2686_v61, %s1932_s6  ;;  %v1374_v55 = vmul.f32 1.442695, %v1360_v16 }
 0x6c3   :  { %1880 = vpow2.f32 %v1374_v55 }
 0x6c4   :  { %1882 = vpow2.f32 %v1372_v56  ;;  %v2698_v12 = vpop.eup %1870 }
 0x6c5   :  { %v2700_v43 = vpop.eup %1872  ;;  %1884 = vpow2.f32 %v1376_v32  ;;  %v1378_v42 = vsel %vm1329_vm6, %v2698_v12, 0.0 }
 0x6c6   :  { %v1381_v4 = vsel %vm1329_vm6, %v2700_v43, 0.0 }
 0x6c8   :  { %v2704_v35 = vpop.eup %1874 }
 0x6c9   :  { %v1384_v62 = vsel %vm1329_vm6, %v2704_v35, 0.0 }
 0x6cc   :  { %v2708_v46 = vpop.eup %1876 }
 0x6cd   :  { %v2712_v25 = vpop.eup %1878  ;;  %v1390_v1 = vsel %vm1329_vm6, %v2708_v46, 0.0 }
 0x6ce   :  { %v1387_v21 = vsel %vm1329_vm6, %v2712_v25, 0.0 }
 0x6d0   :  { %v2716_v31 = vpop.eup %1880 }
 0x6d1   :  { %v2720_v30 = vpop.eup %1882  ;;  %v1396_v18 = vsel %vm1329_vm6, %v2716_v31, 0.0 }
 0x6d2   :  { %v1393_v22 = vsel %vm1329_vm6, %v2720_v30, 0.0  ;;  %v2726_v63 = vpop.eup %1884 }
 0x6d3   :  { %v1399_v45 = vsel %vm1329_vm6, %v2726_v63, 0.0 }
 0x6e0   :  { %1379 = vadd.xlane.f32.xlu0 %v1378_v42 }
 0x6e3   :  { %1382 = vadd.xlane.f32.xlu1 %v1381_v4 }
 0x6e4   :  { %1385 = vadd.xlane.f32.xlu0 %v1384_v62 }
 0x6e7   :  { %1391 = vadd.xlane.f32.xlu1 %v1390_v1 }
 0x6e8   :  { %1388 = vadd.xlane.f32.xlu0 %v1387_v21 }
 0x6eb   :  { %1397 = vadd.xlane.f32.xlu1 %v1396_v18 }
 0x6ec   :  { %1394 = vadd.xlane.f32.xlu0 %v1393_v22 }
 0x6ed   :  { %v1494_v58 = vpop.permute.xlu0 %1493 }
 0x6ee   :  { %v1518_v36 = vsel %vm1329_vm6, %v1494_v58, 0.0 }
 0x6ef   :  { %v1492_v34 = vpop.permute.xlu1 %1491 }
 0x6f0   :  { %v1515_v24 = vsel %vm1329_vm6, %v1492_v34, 0.0  ;;  %1400 = vadd.xlane.f32.xlu0 %v1399_v45 }
 0x6f1   :  { %1516 = vadd.xlane.f32.xlu1 %v1515_v24 }
 0x6f4   :  { %1519 = vadd.xlane.f32.xlu0 %v1518_v36 }
 0x722   :  { %v1498_v38 = vpop.permute.xlu1 %1497 }
 0x723   :  { %v1524_v9 = vsel %vm1329_vm6, %v1498_v38, 0.0 }
 0x724   :  { %1525 = vadd.xlane.f32.xlu0 %v1524_v9 }
 0x726   :  { %v1496_v15 = vpop.permute.xlu1 %1495 }
 0x727   :  { %v1521_v26 = vsel %vm1329_vm6, %v1496_v15, 0.0 }
 0x728   :  { %v1500_v44 = vpop.permute.xlu0 %1499  ;;  %1522 = vadd.xlane.f32.xlu1 %v1521_v26 }
 0x729   :  { %v1527_v20 = vsel %vm1329_vm6, %v1500_v44, 0.0 }
 0x72a   :  { %v1502_v57 = vpop.permute.xlu1 %1501 }
 0x72b   :  { %v1530_v48 = vsel %vm1329_vm6, %v1502_v57, 0.0 }
 0x72c   :  { %1528 = vadd.xlane.f32.xlu1 %v1527_v20  ;;  %1531 = vadd.xlane.f32.xlu0 %v1530_v48 }
 0x731   :  { %v1506_v59 = vpop.permute.xlu1 %1505 }
 0x732   :  { %v1536_v6 = vsel %vm1329_vm6, %v1506_v59, 0.0 }
 0x733   :  { %v1504_v7 = vpop.permute.xlu0 %1503  ;;  %1537 = vadd.xlane.f32.xlu0 %v1536_v6 }
 0x734   :  { %v1533_v33 = vsel %vm1329_vm6, %v1504_v7, 0.0 }
 0x735   :  { %1534 = vadd.xlane.f32.xlu1 %v1533_v33 }
 0x769   :  { %v1380_v53 = vpop.xlane.xlu0 %1379 }
 0x76a   :  { %1886 = vrcp.f32 %v1380_v53 }
 0x76c   :  { %v1383_v0 = vpop.xlane.xlu1 %1382 }
 0x76d   :  { %v1386_v47 = vpop.xlane.xlu0 %1385  ;;  %1888 = vrcp.f32 %v1383_v0 }
 0x770   :  { %v1392_v17 = vpop.xlane.xlu1 %1391 }
 0x771   :  { %v1389_v60 = vpop.xlane.xlu0 %1388 }
 0x774   :  { %v1398_v10 = vpop.xlane.xlu1 %1397 }
 0x775   :  { %v1395_v51 = vpop.xlane.xlu0 %1394 }
 0x777   :  { %v1887_v29 = vpop.eup %1886 }
 0x778   :  { %v1410_v11 = vmul.f32 %v1887_v29, %v2698_v12 }
 0x779   :  { %v1401_v39 = vpop.xlane.xlu0 %1400 }
 0x77a   :  { %v1517_v3 = vpop.xlane.xlu1 %1516  ;;  %v1889_v23 = vpop.eup %1888  ;;  %v1418_v2 = vmax.f32 %v1410_v11, 1e-15 }
 0x77b   :  { %1890 = vrcp.f32 %v1517_v3  ;;  %v1411_v13 = vmul.f32 %v1889_v23, %v2700_v43 }
 0x77c   :  { %v1426_v56 = vmin.f32 %v1418_v2, 1.0 }
 0x77d   :  { %v1520_v50 = vpop.xlane.xlu0 %1519  ;;  %v1419_v54 = vmax.f32 %v1411_v13, 1e-15 }
 0x77e   :  { %1892 = vrcp.f32 %v1520_v50 }
 0x77f   :  { %v1427_v4 = vmin.f32 %v1419_v54, 1.0  ;;  %1894 = vrcp.f32 %v1389_v60 }
 0x780   :  { %1896 = vrcp.f32 %v1386_v47 }
 0x788   :  { %v1891_v52 = vpop.eup %1890 }
 0x789   :  { %v1547_v16 = vmul.f32 %v1891_v52, %v2656_v49 }
 0x78b   :  { %v1893_v14 = vpop.eup %1892  ;;  %v1555_v8 = vmax.f32 %v1547_v16, 1e-15 }
 0x78c   :  { %v1548_v55 = vmul.f32 %v1893_v14, %v2652_v27  ;;  %v1895_v62 = vpop.eup %1894 }
 0x78d   :  { %v1563_v41 = vmin.f32 %v1555_v8, 1.0  ;;  %v1897_v18 = vpop.eup %1896  ;;  %v1413_v22 = vmul.f32 %v1895_v62, %v2712_v25 }
 0x78e   :  { %v1556_v32 = vmax.f32 %v1548_v55, 1e-15  ;;  %v1412_v45 = vmul.f32 %v1897_v18, %v2704_v35 }
 0x78f   :  { %v1571_v42 = vsel %vm1329_vm6, %v1426_v56, %v1563_v41  ;;  %v1421_v58 = vmax.f32 %v1413_v22, 1e-15 }
 0x790   :  { %1579 = vst.msk [vmem:[%s2801_s7] sm:$0xff] %vm264_vm3, %v1571_v42  ;;  %v1564_v12 = vmin.f32 %v1556_v32, 1.0  ;;  %v1420_v57 = vmax.f32 %v1412_v45, 1e-15 }
 0x791   :  { %v1429_v20 = vmin.f32 %v1421_v58, 1.0 }
 0x792   :  { %v1572_v43 = vsel %vm1329_vm6, %v1427_v4, %v1564_v12  ;;  %v1428_v0 = vmin.f32 %v1420_v57, 1.0 }
 0x793   :  { %1580 = vst.msk [vmem:[%s2801_s7 + $0x8] sm:$0xff] %vm264_vm3, %v1572_v43 }
 0x7ad   :  { %v1526_v27 = vpop.xlane.xlu0 %1525 }
 0x7ae   :  { %1898 = vrcp.f32 %v1526_v27 }
 0x7af   :  { %1900 = vrcp.f32 %v1395_v51 }
 0x7b0   :  { %1902 = vrcp.f32 %v1392_v17 }
 0x7b1   :  { %v1523_v49 = vpop.xlane.xlu1 %1522 }
 0x7b2   :  { %1904 = vrcp.f32 %v1523_v49 }
 0x7b3   :  { %1906 = vrcp.f32 %v1401_v39 }
 0x7b5   :  { %v1532_v1 = vpop.xlane.xlu0 %1531  ;;  %v1529_v21 = vpop.xlane.xlu1 %1528 }
 0x7b6   :  { %1908 = vrcp.f32 %v1532_v1 }
 0x7b7   :  { %1910 = vrcp.f32 %v1529_v21 }
 0x7b8   :  { %1912 = vrcp.f32 %v1398_v10 }
 0x7bb   :  { %v1899_v34 = vpop.eup %1898 }
 0x7bc   :  { %v1550_v24 = vmul.f32 %v1899_v34, %v2665_v28  ;;  %v1538_v36 = vpop.xlane.xlu0 %1537  ;;  %v1901_v38 = vpop.eup %1900 }
 0x7bd   :  { %1914 = vrcp.f32 %v1538_v36  ;;  %v1903_v9 = vpop.eup %1902  ;;  %v1415_v48 = vmul.f32 %v1901_v38, %v2720_v30 }
 0x7be   :  { %v1558_v15 = vmax.f32 %v1550_v24, 1e-15  ;;  %v1535_v26 = vpop.xlane.xlu1 %1534  ;;  %v1414_v35 = vmul.f32 %v1903_v9, %v2708_v46 }
 0x7bf   :  { %v1905_v44 = vpop.eup %1904  ;;  %1916 = vrcp.f32 %v1535_v26  ;;  %v1423_v47 = vmax.f32 %v1415_v48, 1e-15 }
 0x7c0   :  { %v1566_v25 = vmin.f32 %v1558_v15, 1.0  ;;  %v1549_v59 = vmul.f32 %v1905_v44, %v2670_v5  ;;  %v1907_v6 = vpop.eup %1906  ;;  %v1422_v60 = vmax.f32 %v1414_v35, 1e-15 }
 0x7c1   :  { %v1417_v39 = vmul.f32 %v1907_v6, %v2726_v63  ;;  %v1431_v50 = vmin.f32 %v1423_v47, 1.0 }
 0x7c2   :  { %v1574_v28 = vsel %vm1329_vm6, %v1429_v20, %v1566_v25  ;;  %v1557_v7 = vmax.f32 %v1549_v59, 1e-15  ;;  %v1430_v23 = vmin.f32 %v1422_v60, 1.0 }
 0x7c3   :  { %v1909_v33 = vpop.eup %1908  ;;  %1582 = vst.msk [vmem:[%s2801_s7 + $0x18] sm:$0xff] %vm264_vm3, %v1574_v28  ;;  %v1425_v13 = vmax.f32 %v1417_v39, 1e-15 }
 0x7c4   :  { %v1911_v53 = vpop.eup %1910  ;;  %v1565_v17 = vmin.f32 %v1557_v7, 1.0  ;;  %v1552_v30 = vmul.f32 %v1909_v33, %v2678_v40 }
 0x7c5   :  { %v1551_v5 = vmul.f32 %v1911_v53, %v2674_v37  ;;  %v1913_v46 = vpop.eup %1912  ;;  %v1433_v54 = vmin.f32 %v1425_v13, 1.0 }
 0x7c6   :  { %v1573_v51 = vsel %vm1329_vm6, %v1428_v0, %v1565_v17  ;;  %v1560_v10 = vmax.f32 %v1552_v30, 1e-15  ;;  %v1416_v40 = vmul.f32 %v1913_v46, %v2716_v31 }
 0x7c7   :  { %1581 = vst.msk [vmem:[%s2801_s7 + $0x10] sm:$0xff] %vm264_vm3, %v1573_v51  ;;  %v1559_v3 = vmax.f32 %v1551_v5, 1e-15 }
 0x7c8   :  { %v1568_v29 = vmin.f32 %v1560_v10, 1.0  ;;  %v1424_v31 = vmax.f32 %v1416_v40, 1e-15 }
 0x7c9   :  { %v1567_v11 = vmin.f32 %v1559_v3, 1.0 }
 0x7ca   :  { %v1915_v52 = vpop.eup %1914  ;;  %v1576_v37 = vsel %vm1329_vm6, %v1431_v50, %v1568_v29  ;;  %v1432_v41 = vmin.f32 %v1424_v31, 1.0 }
 0x7cb   :  { %1584 = vst.msk [vmem:[%s2801_s7 + $0x28] sm:$0xff] %vm264_vm3, %v1576_v37  ;;  %v1575_v63 = vsel %vm1329_vm6, %v1430_v23, %v1567_v11  ;;  %v1554_v2 = vmul.f32 %v1915_v52, %v2682_v19 }
 0x7cc   :  { %v1917_v16 = vpop.eup %1916  ;;  %1583 = vst.msk [vmem:[%s2801_s7 + $0x20] sm:$0xff] %vm264_vm3, %v1575_v63 }
 0x7cd   :  { %v1562_v14 = vmax.f32 %v1554_v2, 1e-15  ;;  %v1553_v8 = vmul.f32 %v1917_v16, %v2686_v61 }
 0x7cf   :  { %v1570_v55 = vmin.f32 %v1562_v14, 1.0  ;;  %v1561_v56 = vmax.f32 %v1553_v8, 1e-15 }
 0x7d1   :  { %v1578_v32 = vsel %vm1329_vm6, %v1433_v54, %v1570_v55  ;;  %v1569_v42 = vmin.f32 %v1561_v56, 1.0 }
 0x7d2   :  { %1586 = vst.msk [vmem:[%s2801_s7 + $0x38] sm:$0xff] %vm264_vm3, %v1578_v32 }
 0x7d3   :  { %v1577_v19 = vsel %vm1329_vm6, %v1432_v41, %v1569_v42 }
 0x7d4   :  { %1585 = vst.msk [vmem:[%s2801_s7 + $0x30] sm:$0xff] %vm264_vm3, %v1577_v19 }

</bundles_post_ra>
